<compile_context>
chip_gen: v7x
topology: tpu7x:2x2x1
jax: 0.10.0
libtpu: 0.0.40
codegen_flags: <defaults>
</compile_context>

<pallas_src>
import functools
import math

import jax
import jax.numpy as jnp
from jax.experimental import pallas as pl
from jax.experimental.pallas import tpu as pltpu


# ----------------------------- VMEM budget ----------------------------------

def _vmem_limit_bytes():
    """~65% of physical VMEM (v7x: 64 MiB, v5e/v6e: 128 MiB), capped at 100 MiB."""
    cap = 64 * 1024 * 1024
    try:
        info = pltpu.get_tpu_info()
        cap = int(getattr(info, "vmem_capacity_bytes", cap)) or cap
    except Exception:
        pass
    return min(int(cap * 0.65), 100 * 1024 * 1024)


_VMEM_LIMIT = _vmem_limit_bytes()


# ----------------------------- helpers -------------------------------------

def _pick_tile(dim, pref, align):
    """Largest tile <= pref that is a multiple of `align` and divides dim.

    Falls back to the full dimension (always legal for BlockSpec)."""
    if dim <= pref:
        return dim
    t = (pref // align) * align
    while t >= align:
        if dim % t == 0:
            return t
        t -= align
    return dim


# ----------------------------- tiled matmul ---------------------------------

def _matmul_kernel(a_ref, b_ref, o_ref, acc_ref):
    @pl.when(pl.program_id(2) == 0)
    def _():
        acc_ref[...] = jnp.zeros_like(acc_ref)

    acc_ref[...] += jnp.dot(a_ref[...], b_ref[...],
                            preferred_element_type=jnp.float32)

    @pl.when(pl.program_id(2) == pl.num_programs(2) - 1)
    def _():
        o_ref[...] = acc_ref[...].astype(o_ref.dtype)


def pl_matmul(a, b, out_dtype=jnp.bfloat16, tm=256, tn=256, tk=512):
    # Operands are cast to bf16 once at the wrapper (all current call sites are
    # already bf16, so this inserts nothing) — no per-tile in-kernel astype.
    if a.dtype != jnp.bfloat16:
        a = a.astype(jnp.bfloat16)
    if b.dtype != jnp.bfloat16:
        b = b.astype(jnp.bfloat16)
    M, K = a.shape
    K2, N = b.shape
    assert K == K2
    tm = _pick_tile(M, tm, 16)     # bf16 packs 2 rows/sublane -> 16-align
    tn = _pick_tile(N, tn, 128)
    tk = _pick_tile(K, tk, 128)
    grid = (M // tm, N // tn, K // tk)
    return pl.pallas_call(
        _matmul_kernel,
        out_shape=jax.ShapeDtypeStruct((M, N), out_dtype),
        grid=grid,
        in_specs=[pl.BlockSpec((tm, tk), lambda i, j, k: (i, k)),
                  pl.BlockSpec((tk, tn), lambda i, j, k: (k, j))],
        out_specs=pl.BlockSpec((tm, tn), lambda i, j, k: (i, j)),
        scratch_shapes=[pltpu.VMEM((tm, tn), jnp.float32)],
        compiler_params=pltpu.CompilerParams(
            dimension_semantics=("parallel", "parallel", "arbitrary"),
            vmem_limit_bytes=_VMEM_LIMIT),
    )(a, b)


# ----------------------------- layernorm kernels ----------------------------

def _ln_kernel(x_ref, g_ref, b_ref, o_ref, *, eps):
    x = x_ref[...].astype(jnp.float32)
    mu = jnp.mean(x, axis=-1, keepdims=True)
    var = jnp.mean(jnp.square(x - mu), axis=-1, keepdims=True)
    o_ref[...] = ((x - mu) * jax.lax.rsqrt(var + eps) * g_ref[...]
                  + b_ref[...]).astype(o_ref.dtype)


def pl_layernorm(x, gamma, beta, eps=1e-5, out_dtype=jnp.bfloat16, tr=256):
    T, H = x.shape
    tr = _pick_tile(T, tr, 16)
    row = pl.BlockSpec((tr, H), lambda i: (i, 0))
    vec = pl.BlockSpec((1, H), lambda i: (0, 0))
    return pl.pallas_call(
        functools.partial(_ln_kernel, eps=eps),
        out_shape=jax.ShapeDtypeStruct((T, H), out_dtype),
        grid=(T // tr,),
        in_specs=[row, vec, vec],
        out_specs=row,
        compiler_params=pltpu.CompilerParams(
            dimension_semantics=("parallel",),
            vmem_limit_bytes=_VMEM_LIMIT),
    )(x, gamma.reshape(1, H), beta.reshape(1, H))


def _add_ln_kernel(x_ref, d_ref, g_ref, b_ref, xo_ref, ho_ref, *, eps):
    x = x_ref[...].astype(jnp.float32) + d_ref[...].astype(jnp.float32)
    xo_ref[...] = x.astype(xo_ref.dtype)
    mu = jnp.mean(x, axis=-1, keepdims=True)
    var = jnp.mean(jnp.square(x - mu), axis=-1, keepdims=True)
    ho_ref[...] = ((x - mu) * jax.lax.rsqrt(var + eps) * g_ref[...]
                   + b_ref[...]).astype(ho_ref.dtype)


def pl_add_layernorm(x, delta, gamma, beta, eps=1e-5, tr=128):
    """Fused residual add + LayerNorm: returns (x + delta, LN(x + delta)).

    TODO(synk): optionally keep the residual stream bf16 on v5e (HBM-bound)."""
    T, H = x.shape
    tr = _pick_tile(T, tr, 16)
    row = pl.BlockSpec((tr, H), lambda i: (i, 0))
    vec = pl.BlockSpec((1, H), lambda i: (0, 0))
    return pl.pallas_call(
        functools.partial(_add_ln_kernel, eps=eps),
        out_shape=(jax.ShapeDtypeStruct((T, H), jnp.float32),
                   jax.ShapeDtypeStruct((T, H), jnp.bfloat16)),
        grid=(T // tr,),
        in_specs=[row, row, vec, vec],
        out_specs=(row, row),
        compiler_params=pltpu.CompilerParams(
            dimension_semantics=("parallel",),
            vmem_limit_bytes=_VMEM_LIMIT),
    )(x, delta, gamma.reshape(1, H), beta.reshape(1, H))


# ----------------------------- flash attention ------------------------------

def _flash_kernel(q_ref, k_ref, v_ref, o_ref, m_sc, l_sc, acc_sc):
    ki = pl.program_id(2)

    @pl.when(ki == 0)
    def _():
        m_sc[...] = jnp.full_like(m_sc, -jnp.inf)
        l_sc[...] = jnp.zeros_like(l_sc)
        acc_sc[...] = jnp.zeros_like(acc_sc)

    q = q_ref[0]                                   # (tq, dq) bf16, pre-scaled
    k = k_ref[0]                                   # (tk, dq) bf16
    v = v_ref[0]                                   # (tk, dv) bf16
    s = jax.lax.dot_general(q, k, (((1,), (1,)), ((), ())),
                            preferred_element_type=jnp.float32)
    m_prev = m_sc[...]
    m_new = jnp.maximum(m_prev, jnp.max(s, axis=-1, keepdims=True))
    alpha = jnp.exp(m_prev - m_new)
    p = jnp.exp(s - m_new)
    l_sc[...] = alpha * l_sc[...] + jnp.sum(p, axis=-1, keepdims=True)
    acc_sc[...] = alpha * acc_sc[...] + jnp.dot(p.astype(v.dtype), v,
                                                preferred_element_type=jnp.float32)
    m_sc[...] = m_new

    @pl.when(ki == pl.num_programs(2) - 1)
    def _():
        o_ref[0, :, :] = (acc_sc[...] * pl.reciprocal(l_sc[...], approx=True)
                          ).astype(o_ref.dtype)


def pl_flash_attention(q, k, v, *, tq=256, tk=256):
    """Head-major flash attention.  q,k: (G, S, dq); v: (G, S, dv) with
    G = batch * num_heads.  Non-causal, no mask; the 1/sqrt(dq) softmax scale
    is folded into q_b_w at parameter-init time."""
    G, S, dq = q.shape
    dv = v.shape[-1]
    tq = _pick_tile(S, tq, 16)
    tk = _pick_tile(S, tk, 16)
    return pl.pallas_call(
        _flash_kernel,
        out_shape=jax.ShapeDtypeStruct((G, S, dv), jnp.bfloat16),
        grid=(G, S // tq, S // tk),
        in_specs=[
            pl.BlockSpec((1, tq, dq), lambda g, qi, ki: (g, qi, 0)),
            pl.BlockSpec((1, tk, dq), lambda g, qi, ki: (g, ki, 0)),
            pl.BlockSpec((1, tk, dv), lambda g, qi, ki: (g, ki, 0)),
        ],
        out_specs=pl.BlockSpec((1, tq, dv), lambda g, qi, ki: (g, qi, 0)),
        scratch_shapes=[pltpu.VMEM((tq, 1), jnp.float32),
                        pltpu.VMEM((tq, 1), jnp.float32),
                        pltpu.VMEM((tq, dv), jnp.float32)],
        compiler_params=pltpu.CompilerParams(
            dimension_semantics=("parallel", "parallel", "arbitrary"),
            vmem_limit_bytes=_VMEM_LIMIT),
    )(q, k, v)


# ----------------------------- MoE kernel -----------------------------------

def _moe_kernel(flags_ref, x_ref, rw_ref, wg_ref, wu_ref, wd_ref, o_ref, acc_ref):
    t = pl.program_id(0)
    e = pl.program_id(1)
    i = pl.program_id(2)

    @pl.when(jnp.logical_and(e == 0, i == 0))
    def _():
        acc_ref[...] = jnp.zeros_like(acc_ref)

    # Skip experts with no token routed in this tile (every routing weight in
    # the tile is exactly zero, so the contribution would be zero anyway).
    @pl.when(flags_ref[e * pl.num_programs(0) + t] != 0)
    def _():
        x = x_ref[...]                                       # (tm, H) bf16
        g = jnp.dot(x, wg_ref[0], preferred_element_type=jnp.float32)
        u = jnp.dot(x, wu_ref[0], preferred_element_type=jnp.float32)
        hidden = (g * jax.nn.sigmoid(g)) * u                 # SwiGLU (SiLU gate)
        # routing weight applied on the (tm, ti) hidden (cheaper than (tm, H))
        hidden = (rw_ref[0] * hidden).astype(jnp.bfloat16)
        acc_ref[...] += jnp.dot(hidden, wd_ref[0],
                                preferred_element_type=jnp.float32)

    @pl.when(jnp.logical_and(e == pl.num_programs(1) - 1,
                             i == pl.num_programs(2) - 1))
    def _():
        o_ref[...] = acc_ref[...].astype(o_ref.dtype)


def pl_moe(x, rw, wg, wu, wd, tm=256, ti=256):
    """x: (T, H); rw: (T, E_total) routing weights (0 for unselected experts);
    w*: (E_total, H, I) / (E_total, I, H).

    Grid (token tiles, experts, intermediate chunks); one expert chunk resident
    per step; f32 accumulator revisits the token tile; dead (expert, tile)
    combinations are skipped via an SMEM scalar-prefetch flag.
    TODO(synk): token-sorted grouped matmul (group offsets in the weight
    index_map) would also skip the dead-expert weight DMA."""
    T, H = x.shape
    Et, _, I = wg.shape
    tm = _pick_tile(T, tm, 16)
    ti = _pick_tile(I, ti, 128)
    nt = T // tm

    rw3 = jnp.transpose(rw).reshape(Et, T, 1)
    # per-(expert, token-tile) activity flag, expert-major, flat 1-D for SMEM
    flags = (jnp.max(rw.reshape(nt, tm, Et), axis=1) > 0).astype(jnp.int32)
    flags = jnp.transpose(flags).reshape(-1)                 # (Et * nt,)

    grid_spec = pltpu.PrefetchScalarGridSpec(
        num_scalar_prefetch=1,
        grid=(nt, Et, I // ti),
        in_specs=[pl.BlockSpec((tm, H), lambda t, e, i, f: (t, 0)),
                  pl.BlockSpec((1, tm, 1), lambda t, e, i, f: (e, t, 0)),
                  pl.BlockSpec((1, H, ti), lambda t, e, i, f: (e, 0, i)),
                  pl.BlockSpec((1, H, ti), lambda t, e, i, f: (e, 0, i)),
                  pl.BlockSpec((1, ti, H), lambda t, e, i, f: (e, i, 0))],
        out_specs=pl.BlockSpec((tm, H), lambda t, e, i, f: (t, 0)),
        scratch_shapes=[pltpu.VMEM((tm, H), jnp.float32)])

    return pl.pallas_call(
        _moe_kernel,
        out_shape=jax.ShapeDtypeStruct((T, H), jnp.bfloat16),
        grid_spec=grid_spec,
        compiler_params=pltpu.CompilerParams(
            dimension_semantics=("parallel", "arbitrary", "arbitrary"),
            vmem_limit_bytes=_VMEM_LIMIT),
    )(flags, x, rw3, wg, wu, wd)


# ----------------------------- model pieces ---------------------------------

def mla_attention(h2d, p, B, S, cfg):
    NH = cfg['num_attention_heads']
    dq = cfg['qk_rope_head_dim']
    dv = cfg['v_head_dim']

    qa = pl_matmul(h2d, p['q_a_w'])                            # (T, qr)
    qa = pl_layernorm(qa, p['q_a_ln_g'], p['q_a_ln_b'])
    q = pl_matmul(qa, p['q_b_w'])                              # (T, NH*dq), scale folded

    # TODO(synk): k_pe / RoPE columns of kv_a_proj_with_mqa are unused by the
    # reference forward, so they are never computed (weight slimmed to (H, kvr)).
    kv_lat = pl_matmul(h2d, p['kv_a_w'])                       # (T, kvr)
    kv_lat = pl_layernorm(kv_lat, p['kv_a_ln_g'], p['kv_a_ln_b'])
    kv = pl_matmul(kv_lat, p['kv_b_w'])                        # (T, NH*(dq+dv)) fused [K|V]
    k = kv[:, :NH * dq]
    v = kv[:, NH * dq:]

    def to_head_major(t, d):
        return (t.reshape(B, S, NH, d).transpose(0, 2, 1, 3)
                 .reshape(B * NH, S, d))

    o = pl_flash_attention(to_head_major(q, dq), to_head_major(k, dq),
                           to_head_major(v, dv))               # (B*NH, S, dv)
    o = (o.reshape(B, NH, S, dv).transpose(0, 2, 1, 3)
          .reshape(B * S, NH * dv))
    return pl_matmul(o, p['o_w'])                              # (T, H)


def moe_layer(h2d, p, cfg):
    T = h2d.shape[0]
    E = cfg['n_routed_experts']
    Es = cfg['n_shared_experts']
    k = cfg['n_activated_experts']

    logits = pl_matmul(h2d, p['gate_w'], out_dtype=jnp.float32)  # (T, E)
    probs = jax.nn.softmax(logits, axis=-1)
    top_p, top_i = jax.lax.top_k(probs, k)          # torch.topk semantics
    top_p = jax.nn.softmax(top_p, axis=-1)          # re-normalize top-k probs
    rw = jnp.zeros((T, E), jnp.float32).at[
        jnp.arange(T)[:, None], top_i].add(top_p)   # 0 for unselected experts
    # shared experts: summed then divided by n_shared  ==  weight 1/Es each
    rw = jnp.concatenate([rw, jnp.full((T, Es), 1.0 / Es, jnp.float32)], axis=-1)
    return pl_moe(h2d, rw, p['wg'], p['wu'], p['wd'])


def forward(params, input_ids, cfg):
    B, S = input_ids.shape
    layers = params['layers']
    L = len(layers)

    x = jnp.take(params['emb'], input_ids.reshape(-1), axis=0)   # (T, H) f32
    h = pl_layernorm(x, layers[0]['in_ln_g'], layers[0]['in_ln_b'])

    for li, lp in enumerate(layers):
        a = mla_attention(h, lp, B, S, cfg)
        x, h = pl_add_layernorm(x, a, lp['post_ln_g'], lp['post_ln_b'])
        m = moe_layer(h, lp, cfg)
        if li + 1 < L:
            g, b = layers[li + 1]['in_ln_g'], layers[li + 1]['in_ln_b']
        else:
            g, b = params['norm_g'], params['norm_b']   # fuse final norm
        x, h = pl_add_layernorm(x, m, g, b)

    logits = pl_matmul(h, params['lm_w'], out_dtype=jnp.float32,
                       tm=512, tn=512, tk=512)          # big tiles for lm_head
    return logits.reshape(B, S, cfg['vocab_size'])


# ----------------------------- parameter init -------------------------------

def init_params(key, cfg):
    H = cfg['hidden_size']; V = cfg['vocab_size']; I = cfg['intermediate_size']
    NH = cfg['num_attention_heads']
    dq = cfg['qk_rope_head_dim']; dv = cfg['v_head_dim']
    qr = cfg['q_lora_rank']; kvr = cfg['kv_lora_rank']
    E = cfg['n_routed_experts']; Es = cfg['n_shared_experts']
    L = cfg['num_layers']

    keys = iter(jax.random.split(key, 12 * L + 4))

    def lin(shape, scale=0.02, dtype=jnp.bfloat16):
        return (jax.random.normal(next(keys), shape, jnp.float32) * scale).astype(dtype)

    def ones(shape):
        return jnp.ones(shape, jnp.float32)

    def zeros(shape):
        return jnp.zeros(shape, jnp.float32)

    params = {
        'emb': lin((V, H), dtype=jnp.float32),
        'norm_g': ones((H,)), 'norm_b': zeros((H,)),
        'lm_w': lin((H, V)),
        'layers': [],
    }
    for _ in range(L):
        lp = {
            'in_ln_g': ones((H,)), 'in_ln_b': zeros((H,)),
            'post_ln_g': ones((H,)), 'post_ln_b': zeros((H,)),
            'q_a_w': lin((H, qr)),
            'q_a_ln_g': ones((qr,)), 'q_a_ln_b': zeros((qr,)),
            # softmax 1/sqrt(dq) folded into q_b_w offline (param-prep time)
            'q_b_w': lin((qr, NH * dq), scale=0.02 / math.sqrt(dq)),
            'kv_a_w': lin((H, kvr)),               # k_pe columns dropped (unused)
            'kv_a_ln_g': ones((kvr,)), 'kv_a_ln_b': zeros((kvr,)),
            'kv_b_w': lin((kvr, NH * (dq + dv))),  # fused, contiguous [K | V] slabs
            'o_w': lin((NH * dv, H)),
            'gate_w': lin((H, E)),
            # routed experts [0, E) followed by shared experts [E, E+Es)
            'wg': lin((E + Es, H, I)),
            'wu': lin((E + Es, H, I)),
            'wd': lin((E + Es, I, H)),
        }
        params['layers'].append(lp)
    return params


# --------------------------------- main --------------------------------------

if __name__ == "__main__":
    cfg = dict(
        vocab_size=64, hidden_size=32, num_layers=2,
        num_attention_heads=4, intermediate_size=64,
        q_lora_rank=16, kv_lora_rank=16,
        qk_rope_head_dim=8, v_head_dim=8,
        n_routed_experts=8, n_shared_experts=2, n_activated_experts=2,
    )
    key = jax.random.PRNGKey(0)
    pkey, ikey = jax.random.split(key)
    params = init_params(pkey, cfg)

    B, S = 2, 8
    input_ids = jax.random.randint(ikey, (B, S), 0, cfg['vocab_size'],
                                   dtype=jnp.int32)

    fwd = jax.jit(lambda p, ids: forward(p, ids, cfg))
    logits = fwd(params, input_ids)
    jax.block_until_ready(logits)
    assert logits.shape == (B, S, cfg['vocab_size'])
    assert bool(jnp.all(jnp.isfinite(logits)))
    print("KERNEL_OK")
</pallas_src>

<mosaic_0001>
module attributes {stable_mosaic.version = 11 : i64} {
  func.func private @main(%arg0: i32) attributes {dimension_semantics = [#tpu.dimension_semantics<core_parallel>], iteration_bounds = array<i64: 2>, tpu.core_type = #tpu.core_type<sc_scalar_subcore>, window_params = []} {
    return
  }
}

module attributes {stable_mosaic.version = 11 : i64} {
  func.func private @main(%arg0: i32) attributes {dimension_semantics = [#tpu.dimension_semantics<core_parallel>], iteration_bounds = array<i64: 2>, tpu.core_type = #tpu.core_type<sc_scalar_subcore>, window_params = []} {
    return
  }
}

module attributes {stable_mosaic.version = 11 : i64} {
  func.func @_matmul_kernel(%arg0: i32, %arg1: i32, %arg2: i32, %arg3: memref<16x16xbf16, #tpu.memory_space<vmem>>, %arg4: memref<16x32xbf16, #tpu.memory_space<vmem>>, %arg5: memref<16x32xbf16, #tpu.memory_space<vmem>>, %arg6: memref<16x32xf32, #tpu.memory_space<vmem>>) attributes {dimension_semantics = [#tpu.dimension_semantics<parallel>, #tpu.dimension_semantics<parallel>, #tpu.dimension_semantics<arbitrary>], iteration_bounds = array<i64: 1, 1, 1>, scalar_prefetch = 0 : i64, scratch_operands = 1 : i64, tpu.core_type = #tpu.core_type<tc>, window_params = [{transform_indices = @transform_0, window_bounds = array<i64: 16, 16>}, {transform_indices = @transform_1, window_bounds = array<i64: 16, 32>}, {transform_indices = @transform_2, window_bounds = array<i64: 16, 32>}]} {
    %c0_i32 = arith.constant 0 : i32
    %0 = arith.cmpi eq, %arg2, %c0_i32 : i32
    %1 = arith.extui %0 : i1 to i32
    %c0_i32_0 = arith.constant 0 : i32
    %2 = arith.cmpi ne, %1, %c0_i32_0 : i32
    scf.if %2 {
      %cst_10 = arith.constant 0.000000e+00 : f32
      %12 = vector.broadcast %cst_10 : f32 to vector<16x32xf32>
      %c0_11 = arith.constant 0 : index
      %c0_12 = arith.constant 0 : index
      %13 = vector.load %arg6[%c0_11, %c0_12] : memref<16x32xf32, #tpu.memory_space<vmem>>, vector<16x32xf32>
      tpu.vector_store %arg6[%c0_11, %c0_12], %12 {strides = array<i32>} : memref<16x32xf32, #tpu.memory_space<vmem>>, vector<16x32xf32>,
    } else {
    }
    %c0 = arith.constant 0 : index
    %c0_1 = arith.constant 0 : index
    %3 = vector.load %arg6[%c0, %c0_1] : memref<16x32xf32, #tpu.memory_space<vmem>>, vector<16x32xf32>
    %c0_2 = arith.constant 0 : index
    %c0_3 = arith.constant 0 : index
    %4 = vector.load %arg3[%c0_2, %c0_3] : memref<16x16xbf16, #tpu.memory_space<vmem>>, vector<16x16xbf16>
    %c0_4 = arith.constant 0 : index
    %c0_5 = arith.constant 0 : index
    %5 = vector.load %arg4[%c0_4, %c0_5] : memref<16x32xbf16, #tpu.memory_space<vmem>>, vector<16x32xbf16>
    %cst = arith.constant dense<0.000000e+00> : vector<16x32xf32>
    %6 = tpu.matmul %4, %5, %cst {dimension_numbers = #tpu.dot_dimension_numbers<[1], [0], [0], [1], [0, 0, 1, 1], [], []>} : vector<16x16xbf16>, vector<16x32xbf16>, vector<16x32xf32> -> vector<16x32xf32>
    %7 = arith.addf %3, %6 : vector<16x32xf32>
    %c0_6 = arith.constant 0 : index
    %c0_7 = arith.constant 0 : index
    %8 = vector.load %arg6[%c0_6, %c0_7] : memref<16x32xf32, #tpu.memory_space<vmem>>, vector<16x32xf32>
    tpu.vector_store %arg6[%c0_6, %c0_7], %7 {strides = array<i32>} : memref<16x32xf32, #tpu.memory_space<vmem>>, vector<16x32xf32>,
    %c0_i32_8 = arith.constant 0 : i32
    %9 = arith.cmpi eq, %arg2, %c0_i32_8 : i32
    %10 = arith.extui %9 : i1 to i32
    %c0_i32_9 = arith.constant 0 : i32
    %11 = arith.cmpi ne, %10, %c0_i32_9 : i32
    scf.if %11 {
      %c0_10 = arith.constant 0 : index
      %c0_11 = arith.constant 0 : index
      %12 = vector.load %arg6[%c0_10, %c0_11] : memref<16x32xf32, #tpu.memory_space<vmem>>, vector<16x32xf32>
      %13 = arith.truncf %12 : vector<16x32xf32> to vector<16x32xbf16>
      %c0_12 = arith.constant 0 : index
      %c0_13 = arith.constant 0 : index
      %14 = vector.load %arg5[%c0_12, %c0_13] : memref<16x32xbf16, #tpu.memory_space<vmem>>, vector<16x32xbf16>
      tpu.vector_store %arg5[%c0_12, %c0_13], %13 {strides = array<i32>} : memref<16x32xbf16, #tpu.memory_space<vmem>>, vector<16x32xbf16>,
    } else {
    }
    return
  }
  func.func @transform_0(%arg0: i32, %arg1: i32, %arg2: i32) -> (i32, i32) {
    %c0_i32 = arith.constant 0 : i32
    return %arg0, %arg2 : i32, i32
  }
  func.func @transform_1(%arg0: i32, %arg1: i32, %arg2: i32) -> (i32, i32) {
    %c0_i32 = arith.constant 0 : i32
    return %arg2, %arg1 : i32, i32
  }
  func.func @transform_2(%arg0: i32, %arg1: i32, %arg2: i32) -> (i32, i32) {
    %c0_i32 = arith.constant 0 : i32
    return %arg0, %arg1 : i32, i32
  }
}

module attributes {stable_mosaic.version = 11 : i64} {
  func.func @_matmul_kernel(%arg0: i32, %arg1: i32, %arg2: i32, %arg3: memref<16x32xbf16, #tpu.memory_space<vmem>>, %arg4: memref<32x16xbf16, #tpu.memory_space<vmem>>, %arg5: memref<16x16xbf16, #tpu.memory_space<vmem>>, %arg6: memref<16x16xf32, #tpu.memory_space<vmem>>) attributes {dimension_semantics = [#tpu.dimension_semantics<parallel>, #tpu.dimension_semantics<parallel>, #tpu.dimension_semantics<arbitrary>], iteration_bounds = array<i64: 1, 1, 1>, scalar_prefetch = 0 : i64, scratch_operands = 1 : i64, tpu.core_type = #tpu.core_type<tc>, window_params = [{transform_indices = @transform_0, window_bounds = array<i64: 16, 32>}, {transform_indices = @transform_1, window_bounds = array<i64: 32, 16>}, {transform_indices = @transform_2, window_bounds = array<i64: 16, 16>}]} {
    %c0_i32 = arith.constant 0 : i32
    %0 = arith.cmpi eq, %arg2, %c0_i32 : i32
    %1 = arith.extui %0 : i1 to i32
    %c0_i32_0 = arith.constant 0 : i32
    %2 = arith.cmpi ne, %1, %c0_i32_0 : i32
    scf.if %2 {
      %cst_10 = arith.constant 0.000000e+00 : f32
      %12 = vector.broadcast %cst_10 : f32 to vector<16x16xf32>
      %c0_11 = arith.constant 0 : index
      %c0_12 = arith.constant 0 : index
      %13 = vector.load %arg6[%c0_11, %c0_12] : memref<16x16xf32, #tpu.memory_space<vmem>>, vector<16x16xf32>
      tpu.vector_store %arg6[%c0_11, %c0_12], %12 {strides = array<i32>} : memref<16x16xf32, #tpu.memory_space<vmem>>, vector<16x16xf32>,
    } else {
    }
    %c0 = arith.constant 0 : index
    %c0_1 = arith.constant 0 : index
    %3 = vector.load %arg6[%c0, %c0_1] : memref<16x16xf32, #tpu.memory_space<vmem>>, vector<16x16xf32>
    %c0_2 = arith.constant 0 : index
    %c0_3 = arith.constant 0 : index
    %4 = vector.load %arg3[%c0_2, %c0_3] : memref<16x32xbf16, #tpu.memory_space<vmem>>, vector<16x32xbf16>
    %c0_4 = arith.constant 0 : index
    %c0_5 = arith.constant 0 : index
    %5 = vector.load %arg4[%c0_4, %c0_5] : memref<32x16xbf16, #tpu.memory_space<vmem>>, vector<32x16xbf16>
    %cst = arith.constant dense<0.000000e+00> : vector<16x16xf32>
    %6 = tpu.matmul %4, %5, %cst {dimension_numbers = #tpu.dot_dimension_numbers<[1], [0], [0], [1], [0, 0, 1, 1], [], []>} : vector<16x32xbf16>, vector<32x16xbf16>, vector<16x16xf32> -> vector<16x16xf32>
    %7 = arith.addf %3, %6 : vector<16x16xf32>
    %c0_6 = arith.constant 0 : index
    %c0_7 = arith.constant 0 : index
    %8 = vector.load %arg6[%c0_6, %c0_7] : memref<16x16xf32, #tpu.memory_space<vmem>>, vector<16x16xf32>
    tpu.vector_store %arg6[%c0_6, %c0_7], %7 {strides = array<i32>} : memref<16x16xf32, #tpu.memory_space<vmem>>, vector<16x16xf32>,
    %c0_i32_8 = arith.constant 0 : i32
    %9 = arith.cmpi eq, %arg2, %c0_i32_8 : i32
    %10 = arith.extui %9 : i1 to i32
    %c0_i32_9 = arith.constant 0 : i32
    %11 = arith.cmpi ne, %10, %c0_i32_9 : i32
    scf.if %11 {
      %c0_10 = arith.constant 0 : index
      %c0_11 = arith.constant 0 : index
      %12 = vector.load %arg6[%c0_10, %c0_11] : memref<16x16xf32, #tpu.memory_space<vmem>>, vector<16x16xf32>
      %13 = arith.truncf %12 : vector<16x16xf32> to vector<16x16xbf16>
      %c0_12 = arith.constant 0 : index
      %c0_13 = arith.constant 0 : index
      %14 = vector.load %arg5[%c0_12, %c0_13] : memref<16x16xbf16, #tpu.memory_space<vmem>>, vector<16x16xbf16>
      tpu.vector_store %arg5[%c0_12, %c0_13], %13 {strides = array<i32>} : memref<16x16xbf16, #tpu.memory_space<vmem>>, vector<16x16xbf16>,
    } else {
    }
    return
  }
  func.func @transform_0(%arg0: i32, %arg1: i32, %arg2: i32) -> (i32, i32) {
    %c0_i32 = arith.constant 0 : i32
    return %arg0, %arg2 : i32, i32
  }
  func.func @transform_1(%arg0: i32, %arg1: i32, %arg2: i32) -> (i32, i32) {
    %c0_i32 = arith.constant 0 : i32
    return %arg2, %arg1 : i32, i32
  }
  func.func @transform_2(%arg0: i32, %arg1: i32, %arg2: i32) -> (i32, i32) {
    %c0_i32 = arith.constant 0 : i32
    return %arg0, %arg1 : i32, i32
  }
}

module attributes {stable_mosaic.version = 11 : i64} {
  func.func @_ln_kernel(%arg0: i32, %arg1: memref<16x16xbf16, #tpu.memory_space<vmem>>, %arg2: memref<1x16xf32, #tpu.memory_space<vmem>>, %arg3: memref<1x16xf32, #tpu.memory_space<vmem>>, %arg4: memref<16x16xbf16, #tpu.memory_space<vmem>>) attributes {dimension_semantics = [#tpu.dimension_semantics<parallel>], iteration_bounds = array<i64: 1>, scalar_prefetch = 0 : i64, scratch_operands = 0 : i64, tpu.core_type = #tpu.core_type<tc>, window_params = [{transform_indices = @transform_0, window_bounds = array<i64: 16, 16>}, {pipeline_mode = #tpu.pipeline_mode<synchronous>, transform_indices = @transform_1, window_bounds = array<i64: 1, 16>}, {pipeline_mode = #tpu.pipeline_mode<synchronous>, transform_indices = @transform_2, window_bounds = array<i64: 1, 16>}, {transform_indices = @transform_3, window_bounds = array<i64: 16, 16>}]} {
    %c0 = arith.constant 0 : index
    %c0_0 = arith.constant 0 : index
    %0 = vector.load %arg1[%c0, %c0_0] : memref<16x16xbf16, #tpu.memory_space<vmem>>, vector<16x16xbf16>
    %1 = arith.extf %0 : vector<16x16xbf16> to vector<16x16xf32>
    %cst = arith.constant dense<0.000000e+00> : vector<16xf32>
    %2 = vector.multi_reduction <add>, %1, %cst [1] : vector<16x16xf32> to vector<16xf32>
    %3 = vector.shape_cast %2 : vector<16xf32> to vector<16x1xf32>
    %cst_1 = arith.constant 1.600000e+01 : f32
    %4 = vector.broadcast %cst_1 : f32 to vector<16x1xf32>
    %5 = arith.divf %3, %4 : vector<16x1xf32>
    %6 = vector.broadcast %5 : vector<16x1xf32> to vector<16x16xf32>
    %7 = arith.subf %1, %6 : vector<16x16xf32>
    %8 = arith.mulf %7, %7 : vector<16x16xf32>
    %cst_2 = arith.constant dense<0.000000e+00> : vector<16xf32>
    %9 = vector.multi_reduction <add>, %8, %cst_2 [1] : vector<16x16xf32> to vector<16xf32>
    %10 = vector.shape_cast %9 : vector<16xf32> to vector<16x1xf32>
    %cst_3 = arith.constant 1.600000e+01 : f32
    %11 = vector.broadcast %cst_3 : f32 to vector<16x1xf32>
    %12 = arith.divf %10, %11 : vector<16x1xf32>
    %13 = vector.broadcast %5 : vector<16x1xf32> to vector<16x16xf32>
    %14 = arith.subf %1, %13 : vector<16x16xf32>
    %cst_4 = arith.constant 9.99999974E-6 : f32
    %15 = vector.broadcast %cst_4 : f32 to vector<16x1xf32>
    %16 = arith.addf %12, %15 : vector<16x1xf32>
    %17 = math.rsqrt %16 : vector<16x1xf32>
    %18 = vector.broadcast %17 : vector<16x1xf32> to vector<16x16xf32>
    %19 = arith.mulf %14, %18 : vector<16x16xf32>
    %c0_5 = arith.constant 0 : index
    %c0_6 = arith.constant 0 : index
    %20 = vector.load %arg2[%c0_5, %c0_6] : memref<1x16xf32, #tpu.memory_space<vmem>>, vector<1x16xf32>
    %21 = vector.broadcast %20 : vector<1x16xf32> to vector<16x16xf32>
    %22 = arith.mulf %19, %21 : vector<16x16xf32>
    %c0_7 = arith.constant 0 : index
    %c0_8 = arith.constant 0 : index
    %23 = vector.load %arg3[%c0_7, %c0_8] : memref<1x16xf32, #tpu.memory_space<vmem>>, vector<1x16xf32>
    %24 = vector.broadcast %23 : vector<1x16xf32> to vector<16x16xf32>
    %25 = arith.addf %22, %24 : vector<16x16xf32>
    %26 = arith.truncf %25 : vector<16x16xf32> to vector<16x16xbf16>
    %c0_9 = arith.constant 0 : index
    %c0_10 = arith.constant 0 : index
    %27 = vector.load %arg4[%c0_9, %c0_10] : memref<16x16xbf16, #tpu.memory_space<vmem>>, vector<16x16xbf16>
    tpu.vector_store %arg4[%c0_9, %c0_10], %26 {strides = array<i32>} : memref<16x16xbf16, #tpu.memory_space<vmem>>, vector<16x16xbf16>,
    return
  }
  func.func @transform_0(%arg0: i32) -> (i32, i32) {
    %c0_i32 = arith.constant 0 : i32
    %c0_i32_0 = arith.constant 0 : i32
    return %arg0, %c0_i32 : i32, i32
  }
  func.func @transform_1(%arg0: i32) -> (i32, i32) {
    %c0_i32 = arith.constant 0 : i32
    %c0_i32_0 = arith.constant 0 : i32
    %c0_i32_1 = arith.constant 0 : i32
    return %c0_i32, %c0_i32_0 : i32, i32
  }
  func.func @transform_2(%arg0: i32) -> (i32, i32) {
    %c0_i32 = arith.constant 0 : i32
    %c0_i32_0 = arith.constant 0 : i32
    %c0_i32_1 = arith.constant 0 : i32
    return %c0_i32, %c0_i32_0 : i32, i32
  }
  func.func @transform_3(%arg0: i32) -> (i32, i32) {
    %c0_i32 = arith.constant 0 : i32
    %c0_i32_0 = arith.constant 0 : i32
    return %arg0, %c0_i32 : i32, i32
  }
}

module attributes {stable_mosaic.version = 11 : i64} {
  func.func @_ln_kernel(%arg0: i32, %arg1: memref<16x32xf32, #tpu.memory_space<vmem>>, %arg2: memref<1x32xf32, #tpu.memory_space<vmem>>, %arg3: memref<1x32xf32, #tpu.memory_space<vmem>>, %arg4: memref<16x32xbf16, #tpu.memory_space<vmem>>) attributes {dimension_semantics = [#tpu.dimension_semantics<parallel>], iteration_bounds = array<i64: 1>, scalar_prefetch = 0 : i64, scratch_operands = 0 : i64, tpu.core_type = #tpu.core_type<tc>, window_params = [{transform_indices = @transform_0, window_bounds = array<i64: 16, 32>}, {pipeline_mode = #tpu.pipeline_mode<synchronous>, transform_indices = @transform_1, window_bounds = array<i64: 1, 32>}, {pipeline_mode = #tpu.pipeline_mode<synchronous>, transform_indices = @transform_2, window_bounds = array<i64: 1, 32>}, {transform_indices = @transform_3, window_bounds = array<i64: 16, 32>}]} {
    %c0 = arith.constant 0 : index
    %c0_0 = arith.constant 0 : index
    %0 = vector.load %arg1[%c0, %c0_0] : memref<16x32xf32, #tpu.memory_space<vmem>>, vector<16x32xf32>
    %cst = arith.constant dense<0.000000e+00> : vector<16xf32>
    %1 = vector.multi_reduction <add>, %0, %cst [1] : vector<16x32xf32> to vector<16xf32>
    %2 = vector.shape_cast %1 : vector<16xf32> to vector<16x1xf32>
    %cst_1 = arith.constant 3.200000e+01 : f32
    %3 = vector.broadcast %cst_1 : f32 to vector<16x1xf32>
    %4 = arith.divf %2, %3 : vector<16x1xf32>
    %5 = vector.broadcast %4 : vector<16x1xf32> to vector<16x32xf32>
    %6 = arith.subf %0, %5 : vector<16x32xf32>
    %7 = arith.mulf %6, %6 : vector<16x32xf32>
    %cst_2 = arith.constant dense<0.000000e+00> : vector<16xf32>
    %8 = vector.multi_reduction <add>, %7, %cst_2 [1] : vector<16x32xf32> to vector<16xf32>
    %9 = vector.shape_cast %8 : vector<16xf32> to vector<16x1xf32>
    %cst_3 = arith.constant 3.200000e+01 : f32
    %10 = vector.broadcast %cst_3 : f32 to vector<16x1xf32>
    %11 = arith.divf %9, %10 : vector<16x1xf32>
    %12 = vector.broadcast %4 : vector<16x1xf32> to vector<16x32xf32>
    %13 = arith.subf %0, %12 : vector<16x32xf32>
    %cst_4 = arith.constant 9.99999974E-6 : f32
    %14 = vector.broadcast %cst_4 : f32 to vector<16x1xf32>
    %15 = arith.addf %11, %14 : vector<16x1xf32>
    %16 = math.rsqrt %15 : vector<16x1xf32>
    %17 = vector.broadcast %16 : vector<16x1xf32> to vector<16x32xf32>
    %18 = arith.mulf %13, %17 : vector<16x32xf32>
    %c0_5 = arith.constant 0 : index
    %c0_6 = arith.constant 0 : index
    %19 = vector.load %arg2[%c0_5, %c0_6] : memref<1x32xf32, #tpu.memory_space<vmem>>, vector<1x32xf32>
    %20 = vector.broadcast %19 : vector<1x32xf32> to vector<16x32xf32>
    %21 = arith.mulf %18, %20 : vector<16x32xf32>
    %c0_7 = arith.constant 0 : index
    %c0_8 = arith.constant 0 : index
    %22 = vector.load %arg3[%c0_7, %c0_8] : memref<1x32xf32, #tpu.memory_space<vmem>>, vector<1x32xf32>
    %23 = vector.broadcast %22 : vector<1x32xf32> to vector<16x32xf32>
    %24 = arith.addf %21, %23 : vector<16x32xf32>
    %25 = arith.truncf %24 : vector<16x32xf32> to vector<16x32xbf16>
    %c0_9 = arith.constant 0 : index
    %c0_10 = arith.constant 0 : index
    %26 = vector.load %arg4[%c0_9, %c0_10] : memref<16x32xbf16, #tpu.memory_space<vmem>>, vector<16x32xbf16>
    tpu.vector_store %arg4[%c0_9, %c0_10], %25 {strides = array<i32>} : memref<16x32xbf16, #tpu.memory_space<vmem>>, vector<16x32xbf16>,
    return
  }
  func.func @transform_0(%arg0: i32) -> (i32, i32) {
    %c0_i32 = arith.constant 0 : i32
    %c0_i32_0 = arith.constant 0 : i32
    return %arg0, %c0_i32 : i32, i32
  }
  func.func @transform_1(%arg0: i32) -> (i32, i32) {
    %c0_i32 = arith.constant 0 : i32
    %c0_i32_0 = arith.constant 0 : i32
    %c0_i32_1 = arith.constant 0 : i32
    return %c0_i32, %c0_i32_0 : i32, i32
  }
  func.func @transform_2(%arg0: i32) -> (i32, i32) {
    %c0_i32 = arith.constant 0 : i32
    %c0_i32_0 = arith.constant 0 : i32
    %c0_i32_1 = arith.constant 0 : i32
    return %c0_i32, %c0_i32_0 : i32, i32
  }
  func.func @transform_3(%arg0: i32) -> (i32, i32) {
    %c0_i32 = arith.constant 0 : i32
    %c0_i32_0 = arith.constant 0 : i32
    return %arg0, %c0_i32 : i32, i32
  }
}

module attributes {stable_mosaic.version = 11 : i64} {
  func.func @_matmul_kernel(%arg0: i32, %arg1: i32, %arg2: i32, %arg3: memref<16x32xbf16, #tpu.memory_space<vmem>>, %arg4: memref<32x32xbf16, #tpu.memory_space<vmem>>, %arg5: memref<16x32xbf16, #tpu.memory_space<vmem>>, %arg6: memref<16x32xf32, #tpu.memory_space<vmem>>) attributes {dimension_semantics = [#tpu.dimension_semantics<parallel>, #tpu.dimension_semantics<parallel>, #tpu.dimension_semantics<arbitrary>], iteration_bounds = array<i64: 1, 1, 1>, scalar_prefetch = 0 : i64, scratch_operands = 1 : i64, tpu.core_type = #tpu.core_type<tc>, window_params = [{transform_indices = @transform_0, window_bounds = array<i64: 16, 32>}, {transform_indices = @transform_1, window_bounds = array<i64: 32, 32>}, {transform_indices = @transform_2, window_bounds = array<i64: 16, 32>}]} {
    %c0_i32 = arith.constant 0 : i32
    %0 = arith.cmpi eq, %arg2, %c0_i32 : i32
    %1 = arith.extui %0 : i1 to i32
    %c0_i32_0 = arith.constant 0 : i32
    %2 = arith.cmpi ne, %1, %c0_i32_0 : i32
    scf.if %2 {
      %cst_10 = arith.constant 0.000000e+00 : f32
      %12 = vector.broadcast %cst_10 : f32 to vector<16x32xf32>
      %c0_11 = arith.constant 0 : index
      %c0_12 = arith.constant 0 : index
      %13 = vector.load %arg6[%c0_11, %c0_12] : memref<16x32xf32, #tpu.memory_space<vmem>>, vector<16x32xf32>
      tpu.vector_store %arg6[%c0_11, %c0_12], %12 {strides = array<i32>} : memref<16x32xf32, #tpu.memory_space<vmem>>, vector<16x32xf32>,
    } else {
    }
    %c0 = arith.constant 0 : index
    %c0_1 = arith.constant 0 : index
    %3 = vector.load %arg6[%c0, %c0_1] : memref<16x32xf32, #tpu.memory_space<vmem>>, vector<16x32xf32>
    %c0_2 = arith.constant 0 : index
    %c0_3 = arith.constant 0 : index
    %4 = vector.load %arg3[%c0_2, %c0_3] : memref<16x32xbf16, #tpu.memory_space<vmem>>, vector<16x32xbf16>
    %c0_4 = arith.constant 0 : index
    %c0_5 = arith.constant 0 : index
    %5 = vector.load %arg4[%c0_4, %c0_5] : memref<32x32xbf16, #tpu.memory_space<vmem>>, vector<32x32xbf16>
    %cst = arith.constant dense<0.000000e+00> : vector<16x32xf32>
    %6 = tpu.matmul %4, %5, %cst {dimension_numbers = #tpu.dot_dimension_numbers<[1], [0], [0], [1], [0, 0, 1, 1], [], []>} : vector<16x32xbf16>, vector<32x32xbf16>, vector<16x32xf32> -> vector<16x32xf32>
    %7 = arith.addf %3, %6 : vector<16x32xf32>
    %c0_6 = arith.constant 0 : index
    %c0_7 = arith.constant 0 : index
    %8 = vector.load %arg6[%c0_6, %c0_7] : memref<16x32xf32, #tpu.memory_space<vmem>>, vector<16x32xf32>
    tpu.vector_store %arg6[%c0_6, %c0_7], %7 {strides = array<i32>} : memref<16x32xf32, #tpu.memory_space<vmem>>, vector<16x32xf32>,
    %c0_i32_8 = arith.constant 0 : i32
    %9 = arith.cmpi eq, %arg2, %c0_i32_8 : i32
    %10 = arith.extui %9 : i1 to i32
    %c0_i32_9 = arith.constant 0 : i32
    %11 = arith.cmpi ne, %10, %c0_i32_9 : i32
    scf.if %11 {
      %c0_10 = arith.constant 0 : index
      %c0_11 = arith.constant 0 : index
      %12 = vector.load %arg6[%c0_10, %c0_11] : memref<16x32xf32, #tpu.memory_space<vmem>>, vector<16x32xf32>
      %13 = arith.truncf %12 : vector<16x32xf32> to vector<16x32xbf16>
      %c0_12 = arith.constant 0 : index
      %c0_13 = arith.constant 0 : index
      %14 = vector.load %arg5[%c0_12, %c0_13] : memref<16x32xbf16, #tpu.memory_space<vmem>>, vector<16x32xbf16>
      tpu.vector_store %arg5[%c0_12, %c0_13], %13 {strides = array<i32>} : memref<16x32xbf16, #tpu.memory_space<vmem>>, vector<16x32xbf16>,
    } else {
    }
    return
  }
  func.func @transform_0(%arg0: i32, %arg1: i32, %arg2: i32) -> (i32, i32) {
    %c0_i32 = arith.constant 0 : i32
    return %arg0, %arg2 : i32, i32
  }
  func.func @transform_1(%arg0: i32, %arg1: i32, %arg2: i32) -> (i32, i32) {
    %c0_i32 = arith.constant 0 : i32
    return %arg2, %arg1 : i32, i32
  }
  func.func @transform_2(%arg0: i32, %arg1: i32, %arg2: i32) -> (i32, i32) {
    %c0_i32 = arith.constant 0 : i32
    return %arg0, %arg1 : i32, i32
  }
}

module attributes {stable_mosaic.version = 11 : i64} {
  func.func @_matmul_kernel(%arg0: i32, %arg1: i32, %arg2: i32, %arg3: memref<16x16xbf16, #tpu.memory_space<vmem>>, %arg4: memref<16x64xbf16, #tpu.memory_space<vmem>>, %arg5: memref<16x64xbf16, #tpu.memory_space<vmem>>, %arg6: memref<16x64xf32, #tpu.memory_space<vmem>>) attributes {dimension_semantics = [#tpu.dimension_semantics<parallel>, #tpu.dimension_semantics<parallel>, #tpu.dimension_semantics<arbitrary>], iteration_bounds = array<i64: 1, 1, 1>, scalar_prefetch = 0 : i64, scratch_operands = 1 : i64, tpu.core_type = #tpu.core_type<tc>, window_params = [{transform_indices = @transform_0, window_bounds = array<i64: 16, 16>}, {transform_indices = @transform_1, window_bounds = array<i64: 16, 64>}, {transform_indices = @transform_2, window_bounds = array<i64: 16, 64>}]} {
    %c0_i32 = arith.constant 0 : i32
    %0 = arith.cmpi eq, %arg2, %c0_i32 : i32
    %1 = arith.extui %0 : i1 to i32
    %c0_i32_0 = arith.constant 0 : i32
    %2 = arith.cmpi ne, %1, %c0_i32_0 : i32
    scf.if %2 {
      %cst_10 = arith.constant 0.000000e+00 : f32
      %12 = vector.broadcast %cst_10 : f32 to vector<16x64xf32>
      %c0_11 = arith.constant 0 : index
      %c0_12 = arith.constant 0 : index
      %13 = vector.load %arg6[%c0_11, %c0_12] : memref<16x64xf32, #tpu.memory_space<vmem>>, vector<16x64xf32>
      tpu.vector_store %arg6[%c0_11, %c0_12], %12 {strides = array<i32>} : memref<16x64xf32, #tpu.memory_space<vmem>>, vector<16x64xf32>,
    } else {
    }
    %c0 = arith.constant 0 : index
    %c0_1 = arith.constant 0 : index
    %3 = vector.load %arg6[%c0, %c0_1] : memref<16x64xf32, #tpu.memory_space<vmem>>, vector<16x64xf32>
    %c0_2 = arith.constant 0 : index
    %c0_3 = arith.constant 0 : index
    %4 = vector.load %arg3[%c0_2, %c0_3] : memref<16x16xbf16, #tpu.memory_space<vmem>>, vector<16x16xbf16>
    %c0_4 = arith.constant 0 : index
    %c0_5 = arith.constant 0 : index
    %5 = vector.load %arg4[%c0_4, %c0_5] : memref<16x64xbf16, #tpu.memory_space<vmem>>, vector<16x64xbf16>
    %cst = arith.constant dense<0.000000e+00> : vector<16x64xf32>
    %6 = tpu.matmul %4, %5, %cst {dimension_numbers = #tpu.dot_dimension_numbers<[1], [0], [0], [1], [0, 0, 1, 1], [], []>} : vector<16x16xbf16>, vector<16x64xbf16>, vector<16x64xf32> -> vector<16x64xf32>
    %7 = arith.addf %3, %6 : vector<16x64xf32>
    %c0_6 = arith.constant 0 : index
    %c0_7 = arith.constant 0 : index
    %8 = vector.load %arg6[%c0_6, %c0_7] : memref<16x64xf32, #tpu.memory_space<vmem>>, vector<16x64xf32>
    tpu.vector_store %arg6[%c0_6, %c0_7], %7 {strides = array<i32>} : memref<16x64xf32, #tpu.memory_space<vmem>>, vector<16x64xf32>,
    %c0_i32_8 = arith.constant 0 : i32
    %9 = arith.cmpi eq, %arg2, %c0_i32_8 : i32
    %10 = arith.extui %9 : i1 to i32
    %c0_i32_9 = arith.constant 0 : i32
    %11 = arith.cmpi ne, %10, %c0_i32_9 : i32
    scf.if %11 {
      %c0_10 = arith.constant 0 : index
      %c0_11 = arith.constant 0 : index
      %12 = vector.load %arg6[%c0_10, %c0_11] : memref<16x64xf32, #tpu.memory_space<vmem>>, vector<16x64xf32>
      %13 = arith.truncf %12 : vector<16x64xf32> to vector<16x64xbf16>
      %c0_12 = arith.constant 0 : index
      %c0_13 = arith.constant 0 : index
      %14 = vector.load %arg5[%c0_12, %c0_13] : memref<16x64xbf16, #tpu.memory_space<vmem>>, vector<16x64xbf16>
      tpu.vector_store %arg5[%c0_12, %c0_13], %13 {strides = array<i32>} : memref<16x64xbf16, #tpu.memory_space<vmem>>, vector<16x64xbf16>,
    } else {
    }
    return
  }
  func.func @transform_0(%arg0: i32, %arg1: i32, %arg2: i32) -> (i32, i32) {
    %c0_i32 = arith.constant 0 : i32
    return %arg0, %arg2 : i32, i32
  }
  func.func @transform_1(%arg0: i32, %arg1: i32, %arg2: i32) -> (i32, i32) {
    %c0_i32 = arith.constant 0 : i32
    return %arg2, %arg1 : i32, i32
  }
  func.func @transform_2(%arg0: i32, %arg1: i32, %arg2: i32) -> (i32, i32) {
    %c0_i32 = arith.constant 0 : i32
    return %arg0, %arg1 : i32, i32
  }
}

module attributes {stable_mosaic.version = 11 : i64} {
  func.func @_add_ln_kernel(%arg0: i32, %arg1: memref<16x32xf32, #tpu.memory_space<vmem>>, %arg2: memref<16x32xbf16, #tpu.memory_space<vmem>>, %arg3: memref<1x32xf32, #tpu.memory_space<vmem>>, %arg4: memref<1x32xf32, #tpu.memory_space<vmem>>, %arg5: memref<16x32xf32, #tpu.memory_space<vmem>>, %arg6: memref<16x32xbf16, #tpu.memory_space<vmem>>) attributes {dimension_semantics = [#tpu.dimension_semantics<parallel>], iteration_bounds = array<i64: 1>, scalar_prefetch = 0 : i64, scratch_operands = 0 : i64, tpu.core_type = #tpu.core_type<tc>, window_params = [{transform_indices = @transform_0, window_bounds = array<i64: 16, 32>}, {transform_indices = @transform_1, window_bounds = array<i64: 16, 32>}, {pipeline_mode = #tpu.pipeline_mode<synchronous>, transform_indices = @transform_2, window_bounds = array<i64: 1, 32>}, {pipeline_mode = #tpu.pipeline_mode<synchronous>, transform_indices = @transform_3, window_bounds = array<i64: 1, 32>}, {transform_indices = @transform_4, window_bounds = array<i64: 16, 32>}, {transform_indices = @transform_5, window_bounds = array<i64: 16, 32>}]} {
    %c0 = arith.constant 0 : index
    %c0_0 = arith.constant 0 : index
    %0 = vector.load %arg1[%c0, %c0_0] : memref<16x32xf32, #tpu.memory_space<vmem>>, vector<16x32xf32>
    %c0_1 = arith.constant 0 : index
    %c0_2 = arith.constant 0 : index
    %1 = vector.load %arg2[%c0_1, %c0_2] : memref<16x32xbf16, #tpu.memory_space<vmem>>, vector<16x32xbf16>
    %2 = arith.extf %1 : vector<16x32xbf16> to vector<16x32xf32>
    %3 = arith.addf %0, %2 : vector<16x32xf32>
    %c0_3 = arith.constant 0 : index
    %c0_4 = arith.constant 0 : index
    %4 = vector.load %arg5[%c0_3, %c0_4] : memref<16x32xf32, #tpu.memory_space<vmem>>, vector<16x32xf32>
    tpu.vector_store %arg5[%c0_3, %c0_4], %3 {strides = array<i32>} : memref<16x32xf32, #tpu.memory_space<vmem>>, vector<16x32xf32>,
    %cst = arith.constant dense<0.000000e+00> : vector<16xf32>
    %5 = vector.multi_reduction <add>, %3, %cst [1] : vector<16x32xf32> to vector<16xf32>
    %6 = vector.shape_cast %5 : vector<16xf32> to vector<16x1xf32>
    %cst_5 = arith.constant 3.200000e+01 : f32
    %7 = vector.broadcast %cst_5 : f32 to vector<16x1xf32>
    %8 = arith.divf %6, %7 : vector<16x1xf32>
    %9 = vector.broadcast %8 : vector<16x1xf32> to vector<16x32xf32>
    %10 = arith.subf %3, %9 : vector<16x32xf32>
    %11 = arith.mulf %10, %10 : vector<16x32xf32>
    %cst_6 = arith.constant dense<0.000000e+00> : vector<16xf32>
    %12 = vector.multi_reduction <add>, %11, %cst_6 [1] : vector<16x32xf32> to vector<16xf32>
    %13 = vector.shape_cast %12 : vector<16xf32> to vector<16x1xf32>
    %cst_7 = arith.constant 3.200000e+01 : f32
    %14 = vector.broadcast %cst_7 : f32 to vector<16x1xf32>
    %15 = arith.divf %13, %14 : vector<16x1xf32>
    %16 = vector.broadcast %8 : vector<16x1xf32> to vector<16x32xf32>
    %17 = arith.subf %3, %16 : vector<16x32xf32>
    %cst_8 = arith.constant 9.99999974E-6 : f32
    %18 = vector.broadcast %cst_8 : f32 to vector<16x1xf32>
    %19 = arith.addf %15, %18 : vector<16x1xf32>
    %20 = math.rsqrt %19 : vector<16x1xf32>
    %21 = vector.broadcast %20 : vector<16x1xf32> to vector<16x32xf32>
    %22 = arith.mulf %17, %21 : vector<16x32xf32>
    %c0_9 = arith.constant 0 : index
    %c0_10 = arith.constant 0 : index
    %23 = vector.load %arg3[%c0_9, %c0_10] : memref<1x32xf32, #tpu.memory_space<vmem>>, vector<1x32xf32>
    %24 = vector.broadcast %23 : vector<1x32xf32> to vector<16x32xf32>
    %25 = arith.mulf %22, %24 : vector<16x32xf32>
    %c0_11 = arith.constant 0 : index
    %c0_12 = arith.constant 0 : index
    %26 = vector.load %arg4[%c0_11, %c0_12] : memref<1x32xf32, #tpu.memory_space<vmem>>, vector<1x32xf32>
    %27 = vector.broadcast %26 : vector<1x32xf32> to vector<16x32xf32>
    %28 = arith.addf %25, %27 : vector<16x32xf32>
    %29 = arith.truncf %28 : vector<16x32xf32> to vector<16x32xbf16>
    %c0_13 = arith.constant 0 : index
    %c0_14 = arith.constant 0 : index
    %30 = vector.load %arg6[%c0_13, %c0_14] : memref<16x32xbf16, #tpu.memory_space<vmem>>, vector<16x32xbf16>
    tpu.vector_store %arg6[%c0_13, %c0_14], %29 {strides = array<i32>} : memref<16x32xbf16, #tpu.memory_space<vmem>>, vector<16x32xbf16>,
    return
  }
  func.func @transform_0(%arg0: i32) -> (i32, i32) {
    %c0_i32 = arith.constant 0 : i32
    %c0_i32_0 = arith.constant 0 : i32
    return %arg0, %c0_i32 : i32, i32
  }
  func.func @transform_1(%arg0: i32) -> (i32, i32) {
    %c0_i32 = arith.constant 0 : i32
    %c0_i32_0 = arith.constant 0 : i32
    return %arg0, %c0_i32 : i32, i32
  }
  func.func @transform_2(%arg0: i32) -> (i32, i32) {
    %c0_i32 = arith.constant 0 : i32
    %c0_i32_0 = arith.constant 0 : i32
    %c0_i32_1 = arith.constant 0 : i32
    return %c0_i32, %c0_i32_0 : i32, i32
  }
  func.func @transform_3(%arg0: i32) -> (i32, i32) {
    %c0_i32 = arith.constant 0 : i32
    %c0_i32_0 = arith.constant 0 : i32
    %c0_i32_1 = arith.constant 0 : i32
    return %c0_i32, %c0_i32_0 : i32, i32
  }
  func.func @transform_4(%arg0: i32) -> (i32, i32) {
    %c0_i32 = arith.constant 0 : i32
    %c0_i32_0 = arith.constant 0 : i32
    return %arg0, %c0_i32 : i32, i32
  }
  func.func @transform_5(%arg0: i32) -> (i32, i32) {
    %c0_i32 = arith.constant 0 : i32
    %c0_i32_0 = arith.constant 0 : i32
    return %arg0, %c0_i32 : i32, i32
  }
}

module attributes {stable_mosaic.version = 11 : i64} {
  func.func @_flash_kernel(%arg0: i32, %arg1: i32, %arg2: i32, %arg3: memref<1x8x8xbf16, #tpu.memory_space<vmem>>, %arg4: memref<1x8x8xbf16, #tpu.memory_space<vmem>>, %arg5: memref<1x8x8xbf16, #tpu.memory_space<vmem>>, %arg6: memref<1x8x8xbf16, #tpu.memory_space<vmem>>, %arg7: memref<8x1xf32, #tpu.memory_space<vmem>>, %arg8: memref<8x1xf32, #tpu.memory_space<vmem>>, %arg9: memref<8x8xf32, #tpu.memory_space<vmem>>) attributes {dimension_semantics = [#tpu.dimension_semantics<parallel>, #tpu.dimension_semantics<parallel>, #tpu.dimension_semantics<arbitrary>], iteration_bounds = array<i64: 8, 1, 1>, scalar_prefetch = 0 : i64, scratch_operands = 3 : i64, tpu.core_type = #tpu.core_type<tc>, window_params = [{transform_indices = @transform_0, window_bounds = array<i64: 1, 8, 8>}, {transform_indices = @transform_1, window_bounds = array<i64: 1, 8, 8>}, {transform_indices = @transform_2, window_bounds = array<i64: 1, 8, 8>}, {transform_indices = @transform_3, window_bounds = array<i64: 1, 8, 8>}]} {
    %c0_i32 = arith.constant 0 : i32
    %0 = arith.cmpi eq, %arg2, %c0_i32 : i32
    %1 = arith.extui %0 : i1 to i32
    %c0_i32_0 = arith.constant 0 : i32
    %2 = arith.cmpi ne, %1, %c0_i32_0 : i32
    scf.if %2 {
      %cst_26 = arith.constant 0xFF800000 : f32
      %36 = vector.broadcast %cst_26 : f32 to vector<8x1xf32>
      %c0_27 = arith.constant 0 : index
      %c0_28 = arith.constant 0 : index
      %37 = vector.load %arg7[%c0_27, %c0_28] : memref<8x1xf32, #tpu.memory_space<vmem>>, vector<8x1xf32>
      tpu.vector_store %arg7[%c0_27, %c0_28], %36 {strides = array<i32>} : memref<8x1xf32, #tpu.memory_space<vmem>>, vector<8x1xf32>,
      %cst_29 = arith.constant 0.000000e+00 : f32
      %38 = vector.broadcast %cst_29 : f32 to vector<8x1xf32>
      %c0_30 = arith.constant 0 : index
      %c0_31 = arith.constant 0 : index
      %39 = vector.load %arg8[%c0_30, %c0_31] : memref<8x1xf32, #tpu.memory_space<vmem>>, vector<8x1xf32>
      tpu.vector_store %arg8[%c0_30, %c0_31], %38 {strides = array<i32>} : memref<8x1xf32, #tpu.memory_space<vmem>>, vector<8x1xf32>,
      %cst_32 = arith.constant 0.000000e+00 : f32
      %40 = vector.broadcast %cst_32 : f32 to vector<8x8xf32>
      %c0_33 = arith.constant 0 : index
      %c0_34 = arith.constant 0 : index
      %41 = vector.load %arg9[%c0_33, %c0_34] : memref<8x8xf32, #tpu.memory_space<vmem>>, vector<8x8xf32>
      tpu.vector_store %arg9[%c0_33, %c0_34], %40 {strides = array<i32>} : memref<8x8xf32, #tpu.memory_space<vmem>>, vector<8x8xf32>,
    } else {
    }
    %c0 = arith.constant 0 : index
    %c0_1 = arith.constant 0 : index
    %c0_2 = arith.constant 0 : index
    %3 = vector.load %arg3[%c0, %c0_1, %c0_2] : memref<1x8x8xbf16, #tpu.memory_space<vmem>>, vector<1x8x8xbf16>
    %4 = vector.shape_cast %3 : vector<1x8x8xbf16> to vector<8x8xbf16>
    %c0_3 = arith.constant 0 : index
    %c0_4 = arith.constant 0 : index
    %c0_5 = arith.constant 0 : index
    %5 = vector.load %arg4[%c0_3, %c0_4, %c0_5] : memref<1x8x8xbf16, #tpu.memory_space<vmem>>, vector<1x8x8xbf16>
    %6 = vector.shape_cast %5 : vector<1x8x8xbf16> to vector<8x8xbf16>
    %c0_6 = arith.constant 0 : index
    %c0_7 = arith.constant 0 : index
    %c0_8 = arith.constant 0 : index
    %7 = vector.load %arg5[%c0_6, %c0_7, %c0_8] : memref<1x8x8xbf16, #tpu.memory_space<vmem>>, vector<1x8x8xbf16>
    %8 = vector.shape_cast %7 : vector<1x8x8xbf16> to vector<8x8xbf16>
    %cst = arith.constant dense<0.000000e+00> : vector<8x8xf32>
    %9 = tpu.matmul %4, %6, %cst {dimension_numbers = #tpu.dot_dimension_numbers<[1], [1], [0], [0], [0, 0, 1, 0], [], []>} : vector<8x8xbf16>, vector<8x8xbf16>, vector<8x8xf32> -> vector<8x8xf32>
    %c0_9 = arith.constant 0 : index
    %c0_10 = arith.constant 0 : index
    %10 = vector.load %arg7[%c0_9, %c0_10] : memref<8x1xf32, #tpu.memory_space<vmem>>, vector<8x1xf32>
    %cst_11 = arith.constant dense<0xFF800000> : vector<8xf32>
    %11 = vector.multi_reduction <maximumf>, %9, %cst_11 [1] : vector<8x8xf32> to vector<8xf32>
    %12 = vector.shape_cast %11 : vector<8xf32> to vector<8x1xf32>
    %13 = arith.maximumf %10, %12 : vector<8x1xf32>
    %14 = arith.subf %10, %13 : vector<8x1xf32>
    %15 = math.exp %14 : vector<8x1xf32>
    %16 = vector.broadcast %13 : vector<8x1xf32> to vector<8x8xf32>
    %17 = arith.subf %9, %16 : vector<8x8xf32>
    %18 = math.exp %17 : vector<8x8xf32>
    %c0_12 = arith.constant 0 : index
    %c0_13 = arith.constant 0 : index
    %19 = vector.load %arg8[%c0_12, %c0_13] : memref<8x1xf32, #tpu.memory_space<vmem>>, vector<8x1xf32>
    %20 = arith.mulf %15, %19 : vector<8x1xf32>
    %cst_14 = arith.constant dense<0.000000e+00> : vector<8xf32>
    %21 = vector.multi_reduction <add>, %18, %cst_14 [1] : vector<8x8xf32> to vector<8xf32>
    %22 = vector.shape_cast %21 : vector<8xf32> to vector<8x1xf32>
    %23 = arith.addf %20, %22 : vector<8x1xf32>
    %c0_15 = arith.constant 0 : index
    %c0_16 = arith.constant 0 : index
    %24 = vector.load %arg8[%c0_15, %c0_16] : memref<8x1xf32, #tpu.memory_space<vmem>>, vector<8x1xf32>
    tpu.vector_store %arg8[%c0_15, %c0_16], %23 {strides = array<i32>} : memref<8x1xf32, #tpu.memory_space<vmem>>, vector<8x1xf32>,
    %c0_17 = arith.constant 0 : index
    %c0_18 = arith.constant 0 : index
    %25 = vector.load %arg9[%c0_17, %c0_18] : memref<8x8xf32, #tpu.memory_space<vmem>>, vector<8x8xf32>
    %26 = vector.broadcast %15 : vector<8x1xf32> to vector<8x8xf32>
    %27 = arith.mulf %26, %25 : vector<8x8xf32>
    %28 = arith.truncf %18 : vector<8x8xf32> to vector<8x8xbf16>
    %cst_19 = arith.constant dense<0.000000e+00> : vector<8x8xf32>
    %29 = tpu.matmul %28, %8, %cst_19 {dimension_numbers = #tpu.dot_dimension_numbers<[1], [0], [0], [1], [0, 0, 1, 1], [], []>} : vector<8x8xbf16>, vector<8x8xbf16>, vector<8x8xf32> -> vector<8x8xf32>
    %30 = arith.addf %27, %29 : vector<8x8xf32>
    %c0_20 = arith.constant 0 : index
    %c0_21 = arith.constant 0 : index
    %31 = vector.load %arg9[%c0_20, %c0_21] : memref<8x8xf32, #tpu.memory_space<vmem>>, vector<8x8xf32>
    tpu.vector_store %arg9[%c0_20, %c0_21], %30 {strides = array<i32>} : memref<8x8xf32, #tpu.memory_space<vmem>>, vector<8x8xf32>,
    %c0_22 = arith.constant 0 : index
    %c0_23 = arith.constant 0 : index
    %32 = vector.load %arg7[%c0_22, %c0_23] : memref<8x1xf32, #tpu.memory_space<vmem>>, vector<8x1xf32>
    tpu.vector_store %arg7[%c0_22, %c0_23], %13 {strides = array<i32>} : memref<8x1xf32, #tpu.memory_space<vmem>>, vector<8x1xf32>,
    %c0_i32_24 = arith.constant 0 : i32
    %33 = arith.cmpi eq, %arg2, %c0_i32_24 : i32
    %34 = arith.extui %33 : i1 to i32
    %c0_i32_25 = arith.constant 0 : i32
    %35 = arith.cmpi ne, %34, %c0_i32_25 : i32
    scf.if %35 {
      %c0_26 = arith.constant 0 : index
      %c0_27 = arith.constant 0 : index
      %36 = vector.load %arg9[%c0_26, %c0_27] : memref<8x8xf32, #tpu.memory_space<vmem>>, vector<8x8xf32>
      %c0_28 = arith.constant 0 : index
      %c0_29 = arith.constant 0 : index
      %37 = vector.load %arg8[%c0_28, %c0_29] : memref<8x1xf32, #tpu.memory_space<vmem>>, vector<8x1xf32>
      %38 = tpu.reciprocal %37 {approx = true} : vector<8x1xf32> -> vector<8x1xf32>
      %39 = vector.broadcast %38 : vector<8x1xf32> to vector<8x8xf32>
      %40 = arith.mulf %36, %39 : vector<8x8xf32>
      %41 = arith.truncf %40 : vector<8x8xf32> to vector<8x8xbf16>
      %c0_30 = arith.constant 0 : index
      %c0_31 = arith.constant 0 : index
      %c0_32 = arith.constant 0 : index
      %42 = vector.load %arg6[%c0_30, %c0_31, %c0_32] : memref<1x8x8xbf16, #tpu.memory_space<vmem>>, vector<1x8x8xbf16>
      %43 = vector.shape_cast %42 : vector<1x8x8xbf16> to vector<8x8xbf16>
      %44 = vector.shape_cast %41 : vector<8x8xbf16> to vector<1x8x8xbf16>
      tpu.vector_store %arg6[%c0_30, %c0_31, %c0_32], %44 {strides = array<i32>} : memref<1x8x8xbf16, #tpu.memory_space<vmem>>, vector<1x8x8xbf16>,
    } else {
    }
    return
  }
  func.func @transform_0(%arg0: i32, %arg1: i32, %arg2: i32) -> (i32, i32, i32) {
    %c0_i32 = arith.constant 0 : i32
    %c0_i32_0 = arith.constant 0 : i32
    return %arg0, %arg1, %c0_i32 : i32, i32, i32
  }
  func.func @transform_1(%arg0: i32, %arg1: i32, %arg2: i32) -> (i32, i32, i32) {
    %c0_i32 = arith.constant 0 : i32
    %c0_i32_0 = arith.constant 0 : i32
    return %arg0, %arg2, %c0_i32 : i32, i32, i32
  }
  func.func @transform_2(%arg0: i32, %arg1: i32, %arg2: i32) -> (i32, i32, i32) {
    %c0_i32 = arith.constant 0 : i32
    %c0_i32_0 = arith.constant 0 : i32
    return %arg0, %arg2, %c0_i32 : i32, i32, i32
  }
  func.func @transform_3(%arg0: i32, %arg1: i32, %arg2: i32) -> (i32, i32, i32) {
    %c0_i32 = arith.constant 0 : i32
    %c0_i32_0 = arith.constant 0 : i32
    return %arg0, %arg1, %c0_i32 : i32, i32, i32
  }
}

module attributes {stable_mosaic.version = 11 : i64} {
  func.func @_matmul_kernel(%arg0: i32, %arg1: i32, %arg2: i32, %arg3: memref<16x32xbf16, #tpu.memory_space<vmem>>, %arg4: memref<32x8xbf16, #tpu.memory_space<vmem>>, %arg5: memref<16x8xf32, #tpu.memory_space<vmem>>, %arg6: memref<16x8xf32, #tpu.memory_space<vmem>>) attributes {dimension_semantics = [#tpu.dimension_semantics<parallel>, #tpu.dimension_semantics<parallel>, #tpu.dimension_semantics<arbitrary>], iteration_bounds = array<i64: 1, 1, 1>, scalar_prefetch = 0 : i64, scratch_operands = 1 : i64, tpu.core_type = #tpu.core_type<tc>, window_params = [{transform_indices = @transform_0, window_bounds = array<i64: 16, 32>}, {transform_indices = @transform_1, window_bounds = array<i64: 32, 8>}, {transform_indices = @transform_2, window_bounds = array<i64: 16, 8>}]} {
    %c0_i32 = arith.constant 0 : i32
    %0 = arith.cmpi eq, %arg2, %c0_i32 : i32
    %1 = arith.extui %0 : i1 to i32
    %c0_i32_0 = arith.constant 0 : i32
    %2 = arith.cmpi ne, %1, %c0_i32_0 : i32
    scf.if %2 {
      %cst_10 = arith.constant 0.000000e+00 : f32
      %12 = vector.broadcast %cst_10 : f32 to vector<16x8xf32>
      %c0_11 = arith.constant 0 : index
      %c0_12 = arith.constant 0 : index
      %13 = vector.load %arg6[%c0_11, %c0_12] : memref<16x8xf32, #tpu.memory_space<vmem>>, vector<16x8xf32>
      tpu.vector_store %arg6[%c0_11, %c0_12], %12 {strides = array<i32>} : memref<16x8xf32, #tpu.memory_space<vmem>>, vector<16x8xf32>,
    } else {
    }
    %c0 = arith.constant 0 : index
    %c0_1 = arith.constant 0 : index
    %3 = vector.load %arg6[%c0, %c0_1] : memref<16x8xf32, #tpu.memory_space<vmem>>, vector<16x8xf32>
    %c0_2 = arith.constant 0 : index
    %c0_3 = arith.constant 0 : index
    %4 = vector.load %arg3[%c0_2, %c0_3] : memref<16x32xbf16, #tpu.memory_space<vmem>>, vector<16x32xbf16>
    %c0_4 = arith.constant 0 : index
    %c0_5 = arith.constant 0 : index
    %5 = vector.load %arg4[%c0_4, %c0_5] : memref<32x8xbf16, #tpu.memory_space<vmem>>, vector<32x8xbf16>
    %cst = arith.constant dense<0.000000e+00> : vector<16x8xf32>
    %6 = tpu.matmul %4, %5, %cst {dimension_numbers = #tpu.dot_dimension_numbers<[1], [0], [0], [1], [0, 0, 1, 1], [], []>} : vector<16x32xbf16>, vector<32x8xbf16>, vector<16x8xf32> -> vector<16x8xf32>
    %7 = arith.addf %3, %6 : vector<16x8xf32>
    %c0_6 = arith.constant 0 : index
    %c0_7 = arith.constant 0 : index
    %8 = vector.load %arg6[%c0_6, %c0_7] : memref<16x8xf32, #tpu.memory_space<vmem>>, vector<16x8xf32>
    tpu.vector_store %arg6[%c0_6, %c0_7], %7 {strides = array<i32>} : memref<16x8xf32, #tpu.memory_space<vmem>>, vector<16x8xf32>,
    %c0_i32_8 = arith.constant 0 : i32
    %9 = arith.cmpi eq, %arg2, %c0_i32_8 : i32
    %10 = arith.extui %9 : i1 to i32
    %c0_i32_9 = arith.constant 0 : i32
    %11 = arith.cmpi ne, %10, %c0_i32_9 : i32
    scf.if %11 {
      %c0_10 = arith.constant 0 : index
      %c0_11 = arith.constant 0 : index
      %12 = vector.load %arg6[%c0_10, %c0_11] : memref<16x8xf32, #tpu.memory_space<vmem>>, vector<16x8xf32>
      %c0_12 = arith.constant 0 : index
      %c0_13 = arith.constant 0 : index
      %13 = vector.load %arg5[%c0_12, %c0_13] : memref<16x8xf32, #tpu.memory_space<vmem>>, vector<16x8xf32>
      tpu.vector_store %arg5[%c0_12, %c0_13], %12 {strides = array<i32>} : memref<16x8xf32, #tpu.memory_space<vmem>>, vector<16x8xf32>,
    } else {
    }
    return
  }
  func.func @transform_0(%arg0: i32, %arg1: i32, %arg2: i32) -> (i32, i32) {
    %c0_i32 = arith.constant 0 : i32
    return %arg0, %arg2 : i32, i32
  }
  func.func @transform_1(%arg0: i32, %arg1: i32, %arg2: i32) -> (i32, i32) {
    %c0_i32 = arith.constant 0 : i32
    return %arg2, %arg1 : i32, i32
  }
  func.func @transform_2(%arg0: i32, %arg1: i32, %arg2: i32) -> (i32, i32) {
    %c0_i32 = arith.constant 0 : i32
    return %arg0, %arg1 : i32, i32
  }
}

module attributes {stable_mosaic.version = 11 : i64} {
  func.func @_moe_kernel(%arg0: i32, %arg1: i32, %arg2: i32, %arg3: memref<10xi32, #tpu.memory_space<smem>>, %arg4: memref<16x32xbf16, #tpu.memory_space<vmem>>, %arg5: memref<1x16x1xf32, #tpu.memory_space<vmem>>, %arg6: memref<1x32x64xbf16, #tpu.memory_space<vmem>>, %arg7: memref<1x32x64xbf16, #tpu.memory_space<vmem>>, %arg8: memref<1x64x32xbf16, #tpu.memory_space<vmem>>, %arg9: memref<16x32xbf16, #tpu.memory_space<vmem>>, %arg10: memref<16x32xf32, #tpu.memory_space<vmem>>) attributes {dimension_semantics = [#tpu.dimension_semantics<parallel>, #tpu.dimension_semantics<arbitrary>, #tpu.dimension_semantics<arbitrary>], iteration_bounds = array<i64: 1, 10, 1>, scalar_prefetch = 1 : i64, scratch_operands = 1 : i64, tpu.core_type = #tpu.core_type<tc>, window_params = [{transform_indices = @transform_0, window_bounds = array<i64: 16, 32>}, {transform_indices = @transform_1, window_bounds = array<i64: 1, 16, 1>}, {transform_indices = @transform_2, window_bounds = array<i64: 1, 32, 64>}, {transform_indices = @transform_3, window_bounds = array<i64: 1, 32, 64>}, {transform_indices = @transform_4, window_bounds = array<i64: 1, 64, 32>}, {transform_indices = @transform_5, window_bounds = array<i64: 16, 32>}]} {
    %c0_i32 = arith.constant 0 : i32
    %0 = arith.cmpi eq, %arg1, %c0_i32 : i32
    %c0_i32_0 = arith.constant 0 : i32
    %1 = arith.cmpi eq, %arg2, %c0_i32_0 : i32
    %2 = arith.andi %0, %1 : i1
    %3 = arith.extui %2 : i1 to i32
    %c0_i32_1 = arith.constant 0 : i32
    %4 = arith.cmpi ne, %3, %c0_i32_1 : i32
    scf.if %4 {
      %cst = arith.constant 0.000000e+00 : f32
      %17 = vector.broadcast %cst : f32 to vector<16x32xf32>
      %c0 = arith.constant 0 : index
      %c0_6 = arith.constant 0 : index
      %18 = vector.load %arg10[%c0, %c0_6] : memref<16x32xf32, #tpu.memory_space<vmem>>, vector<16x32xf32>
      tpu.vector_store %arg10[%c0, %c0_6], %17 {strides = array<i32>} : memref<16x32xf32, #tpu.memory_space<vmem>>, vector<16x32xf32>,
    } else {
    }
    %c1_i32 = arith.constant 1 : i32
    %5 = arith.muli %arg1, %c1_i32 : i32
    %6 = arith.addi %5, %arg0 : i32
    %7 = arith.index_cast %6 : i32 to index
    %8 = memref.load %arg3[%7] : memref<10xi32, #tpu.memory_space<smem>>
    %c0_i32_2 = arith.constant 0 : i32
    %9 = arith.cmpi ne, %8, %c0_i32_2 : i32
    %10 = arith.extui %9 : i1 to i32
    %c0_i32_3 = arith.constant 0 : i32
    %11 = arith.cmpi ne, %10, %c0_i32_3 : i32
    scf.if %11 {
      %c0 = arith.constant 0 : index
      %c0_6 = arith.constant 0 : index
      %17 = vector.load %arg4[%c0, %c0_6] : memref<16x32xbf16, #tpu.memory_space<vmem>>, vector<16x32xbf16>
      %c0_7 = arith.constant 0 : index
      %c0_8 = arith.constant 0 : index
      %c0_9 = arith.constant 0 : index
      %18 = vector.load %arg6[%c0_7, %c0_8, %c0_9] : memref<1x32x64xbf16, #tpu.memory_space<vmem>>, vector<1x32x64xbf16>
      %19 = vector.shape_cast %18 : vector<1x32x64xbf16> to vector<32x64xbf16>
      %cst = arith.constant dense<0.000000e+00> : vector<16x64xf32>
      %20 = tpu.matmul %17, %19, %cst {dimension_numbers = #tpu.dot_dimension_numbers<[1], [0], [0], [1], [0, 0, 1, 1], [], []>} : vector<16x32xbf16>, vector<32x64xbf16>, vector<16x64xf32> -> vector<16x64xf32>
      %c0_10 = arith.constant 0 : index
      %c0_11 = arith.constant 0 : index
      %c0_12 = arith.constant 0 : index
      %21 = vector.load %arg7[%c0_10, %c0_11, %c0_12] : memref<1x32x64xbf16, #tpu.memory_space<vmem>>, vector<1x32x64xbf16>
      %22 = vector.shape_cast %21 : vector<1x32x64xbf16> to vector<32x64xbf16>
      %cst_13 = arith.constant dense<0.000000e+00> : vector<16x64xf32>
      %23 = tpu.matmul %17, %22, %cst_13 {dimension_numbers = #tpu.dot_dimension_numbers<[1], [0], [0], [1], [0, 0, 1, 1], [], []>} : vector<16x32xbf16>, vector<32x64xbf16>, vector<16x64xf32> -> vector<16x64xf32>
      %24 = arith.negf %20 : vector<16x64xf32>
      %25 = math.exp %24 : vector<16x64xf32>
      %cst_14 = arith.constant 1.000000e+00 : f32
      %26 = vector.broadcast %cst_14 : f32 to vector<16x64xf32>
      %27 = arith.addf %26, %25 : vector<16x64xf32>
      %28 = arith.divf %26, %27 : vector<16x64xf32>
      %29 = arith.mulf %20, %28 : vector<16x64xf32>
      %30 = arith.mulf %29, %23 : vector<16x64xf32>
      %c0_15 = arith.constant 0 : index
      %c0_16 = arith.constant 0 : index
      %c0_17 = arith.constant 0 : index
      %31 = vector.load %arg5[%c0_15, %c0_16, %c0_17] : memref<1x16x1xf32, #tpu.memory_space<vmem>>, vector<1x16x1xf32>
      %32 = vector.shape_cast %31 : vector<1x16x1xf32> to vector<16x1xf32>
      %33 = vector.broadcast %32 : vector<16x1xf32> to vector<16x64xf32>
      %34 = arith.mulf %33, %30 : vector<16x64xf32>
      %35 = arith.truncf %34 : vector<16x64xf32> to vector<16x64xbf16>
      %c0_18 = arith.constant 0 : index
      %c0_19 = arith.constant 0 : index
      %36 = vector.load %arg10[%c0_18, %c0_19] : memref<16x32xf32, #tpu.memory_space<vmem>>, vector<16x32xf32>
      %c0_20 = arith.constant 0 : index
      %c0_21 = arith.constant 0 : index
      %c0_22 = arith.constant 0 : index
      %37 = vector.load %arg8[%c0_20, %c0_21, %c0_22] : memref<1x64x32xbf16, #tpu.memory_space<vmem>>, vector<1x64x32xbf16>
      %38 = vector.shape_cast %37 : vector<1x64x32xbf16> to vector<64x32xbf16>
      %cst_23 = arith.constant dense<0.000000e+00> : vector<16x32xf32>
      %39 = tpu.matmul %35, %38, %cst_23 {dimension_numbers = #tpu.dot_dimension_numbers<[1], [0], [0], [1], [0, 0, 1, 1], [], []>} : vector<16x64xbf16>, vector<64x32xbf16>, vector<16x32xf32> -> vector<16x32xf32>
      %40 = arith.addf %36, %39 : vector<16x32xf32>
      %c0_24 = arith.constant 0 : index
      %c0_25 = arith.constant 0 : index
      %41 = vector.load %arg10[%c0_24, %c0_25] : memref<16x32xf32, #tpu.memory_space<vmem>>, vector<16x32xf32>
      tpu.vector_store %arg10[%c0_24, %c0_25], %40 {strides = array<i32>} : memref<16x32xf32, #tpu.memory_space<vmem>>, vector<16x32xf32>,
    } else {
    }
    %c9_i32 = arith.constant 9 : i32
    %12 = arith.cmpi eq, %arg1, %c9_i32 : i32
    %c0_i32_4 = arith.constant 0 : i32
    %13 = arith.cmpi eq, %arg2, %c0_i32_4 : i32
    %14 = arith.andi %12, %13 : i1
    %15 = arith.extui %14 : i1 to i32
    %c0_i32_5 = arith.constant 0 : i32
    %16 = arith.cmpi ne, %15, %c0_i32_5 : i32
    scf.if %16 {
      %c0 = arith.constant 0 : index
      %c0_6 = arith.constant 0 : index
      %17 = vector.load %arg10[%c0, %c0_6] : memref<16x32xf32, #tpu.memory_space<vmem>>, vector<16x32xf32>
      %18 = arith.truncf %17 : vector<16x32xf32> to vector<16x32xbf16>
      %c0_7 = arith.constant 0 : index
      %c0_8 = arith.constant 0 : index
      %19 = vector.load %arg9[%c0_7, %c0_8] : memref<16x32xbf16, #tpu.memory_space<vmem>>, vector<16x32xbf16>
      tpu.vector_store %arg9[%c0_7, %c0_8], %18 {strides = array<i32>} : memref<16x32xbf16, #tpu.memory_space<vmem>>, vector<16x32xbf16>,
    } else {
    }
    return
  }
  func.func @transform_0(%arg0: i32, %arg1: i32, %arg2: i32, %arg3: memref<10xi32, #tpu.memory_space<smem>>) -> (i32, i32) {
    %c0_i32 = arith.constant 0 : i32
    %c0_i32_0 = arith.constant 0 : i32
    return %arg0, %c0_i32 : i32, i32
  }
  func.func @transform_1(%arg0: i32, %arg1: i32, %arg2: i32, %arg3: memref<10xi32, #tpu.memory_space<smem>>) -> (i32, i32, i32) {
    %c0_i32 = arith.constant 0 : i32
    %c0_i32_0 = arith.constant 0 : i32
    return %arg1, %arg0, %c0_i32 : i32, i32, i32
  }
  func.func @transform_2(%arg0: i32, %arg1: i32, %arg2: i32, %arg3: memref<10xi32, #tpu.memory_space<smem>>) -> (i32, i32, i32) {
    %c0_i32 = arith.constant 0 : i32
    %c0_i32_0 = arith.constant 0 : i32
    return %arg1, %c0_i32, %arg2 : i32, i32, i32
  }
  func.func @transform_3(%arg0: i32, %arg1: i32, %arg2: i32, %arg3: memref<10xi32, #tpu.memory_space<smem>>) -> (i32, i32, i32) {
    %c0_i32 = arith.constant 0 : i32
    %c0_i32_0 = arith.constant 0 : i32
    return %arg1, %c0_i32, %arg2 : i32, i32, i32
  }
  func.func @transform_4(%arg0: i32, %arg1: i32, %arg2: i32, %arg3: memref<10xi32, #tpu.memory_space<smem>>) -> (i32, i32, i32) {
    %c0_i32 = arith.constant 0 : i32
    %c0_i32_0 = arith.constant 0 : i32
    return %arg1, %arg2, %c0_i32 : i32, i32, i32
  }
  func.func @transform_5(%arg0: i32, %arg1: i32, %arg2: i32, %arg3: memref<10xi32, #tpu.memory_space<smem>>) -> (i32, i32) {
    %c0_i32 = arith.constant 0 : i32
    %c0_i32_0 = arith.constant 0 : i32
    return %arg0, %c0_i32 : i32, i32
  }
}

module attributes {stable_mosaic.version = 11 : i64} {
  func.func @_add_ln_kernel(%arg0: i32, %arg1: memref<16x32xf32, #tpu.memory_space<vmem>>, %arg2: memref<16x32xbf16, #tpu.memory_space<vmem>>, %arg3: memref<1x32xf32, #tpu.memory_space<vmem>>, %arg4: memref<1x32xf32, #tpu.memory_space<vmem>>, %arg5: memref<16x32xf32, #tpu.memory_space<vmem>>, %arg6: memref<16x32xbf16, #tpu.memory_space<vmem>>) attributes {dimension_semantics = [#tpu.dimension_semantics<parallel>], iteration_bounds = array<i64: 1>, scalar_prefetch = 0 : i64, scratch_operands = 0 : i64, tpu.core_type = #tpu.core_type<tc>, window_params = [{transform_indices = @transform_0, window_bounds = array<i64: 16, 32>}, {transform_indices = @transform_1, window_bounds = array<i64: 16, 32>}, {pipeline_mode = #tpu.pipeline_mode<synchronous>, transform_indices = @transform_2, window_bounds = array<i64: 1, 32>}, {pipeline_mode = #tpu.pipeline_mode<synchronous>, transform_indices = @transform_3, window_bounds = array<i64: 1, 32>}, {transform_indices = @transform_4, window_bounds = array<i64: 16, 32>}, {transform_indices = @transform_5, window_bounds = array<i64: 16, 32>}]} {
    %c0 = arith.constant 0 : index
    %c0_0 = arith.constant 0 : index
    %0 = vector.load %arg1[%c0, %c0_0] : memref<16x32xf32, #tpu.memory_space<vmem>>, vector<16x32xf32>
    %c0_1 = arith.constant 0 : index
    %c0_2 = arith.constant 0 : index
    %1 = vector.load %arg2[%c0_1, %c0_2] : memref<16x32xbf16, #tpu.memory_space<vmem>>, vector<16x32xbf16>
    %2 = arith.extf %1 : vector<16x32xbf16> to vector<16x32xf32>
    %3 = arith.addf %0, %2 : vector<16x32xf32>
    %c0_3 = arith.constant 0 : index
    %c0_4 = arith.constant 0 : index
    %4 = vector.load %arg5[%c0_3, %c0_4] : memref<16x32xf32, #tpu.memory_space<vmem>>, vector<16x32xf32>
    tpu.vector_store %arg5[%c0_3, %c0_4], %3 {strides = array<i32>} : memref<16x32xf32, #tpu.memory_space<vmem>>, vector<16x32xf32>,
    %cst = arith.constant dense<0.000000e+00> : vector<16xf32>
    %5 = vector.multi_reduction <add>, %3, %cst [1] : vector<16x32xf32> to vector<16xf32>
    %6 = vector.shape_cast %5 : vector<16xf32> to vector<16x1xf32>
    %cst_5 = arith.constant 3.200000e+01 : f32
    %7 = vector.broadcast %cst_5 : f32 to vector<16x1xf32>
    %8 = arith.divf %6, %7 : vector<16x1xf32>
    %9 = vector.broadcast %8 : vector<16x1xf32> to vector<16x32xf32>
    %10 = arith.subf %3, %9 : vector<16x32xf32>
    %11 = arith.mulf %10, %10 : vector<16x32xf32>
    %cst_6 = arith.constant dense<0.000000e+00> : vector<16xf32>
    %12 = vector.multi_reduction <add>, %11, %cst_6 [1] : vector<16x32xf32> to vector<16xf32>
    %13 = vector.shape_cast %12 : vector<16xf32> to vector<16x1xf32>
    %cst_7 = arith.constant 3.200000e+01 : f32
    %14 = vector.broadcast %cst_7 : f32 to vector<16x1xf32>
    %15 = arith.divf %13, %14 : vector<16x1xf32>
    %16 = vector.broadcast %8 : vector<16x1xf32> to vector<16x32xf32>
    %17 = arith.subf %3, %16 : vector<16x32xf32>
    %cst_8 = arith.constant 9.99999974E-6 : f32
    %18 = vector.broadcast %cst_8 : f32 to vector<16x1xf32>
    %19 = arith.addf %15, %18 : vector<16x1xf32>
    %20 = math.rsqrt %19 : vector<16x1xf32>
    %21 = vector.broadcast %20 : vector<16x1xf32> to vector<16x32xf32>
    %22 = arith.mulf %17, %21 : vector<16x32xf32>
    %c0_9 = arith.constant 0 : index
    %c0_10 = arith.constant 0 : index
    %23 = vector.load %arg3[%c0_9, %c0_10] : memref<1x32xf32, #tpu.memory_space<vmem>>, vector<1x32xf32>
    %24 = vector.broadcast %23 : vector<1x32xf32> to vector<16x32xf32>
    %25 = arith.mulf %22, %24 : vector<16x32xf32>
    %c0_11 = arith.constant 0 : index
    %c0_12 = arith.constant 0 : index
    %26 = vector.load %arg4[%c0_11, %c0_12] : memref<1x32xf32, #tpu.memory_space<vmem>>, vector<1x32xf32>
    %27 = vector.broadcast %26 : vector<1x32xf32> to vector<16x32xf32>
    %28 = arith.addf %25, %27 : vector<16x32xf32>
    %29 = arith.truncf %28 : vector<16x32xf32> to vector<16x32xbf16>
    %c0_13 = arith.constant 0 : index
    %c0_14 = arith.constant 0 : index
    %30 = vector.load %arg6[%c0_13, %c0_14] : memref<16x32xbf16, #tpu.memory_space<vmem>>, vector<16x32xbf16>
    tpu.vector_store %arg6[%c0_13, %c0_14], %29 {strides = array<i32>} : memref<16x32xbf16, #tpu.memory_space<vmem>>, vector<16x32xbf16>,
    return
  }
  func.func @transform_0(%arg0: i32) -> (i32, i32) {
    %c0_i32 = arith.constant 0 : i32
    %c0_i32_0 = arith.constant 0 : i32
    return %arg0, %c0_i32 : i32, i32
  }
  func.func @transform_1(%arg0: i32) -> (i32, i32) {
    %c0_i32 = arith.constant 0 : i32
    %c0_i32_0 = arith.constant 0 : i32
    return %arg0, %c0_i32 : i32, i32
  }
  func.func @transform_2(%arg0: i32) -> (i32, i32) {
    %c0_i32 = arith.constant 0 : i32
    %c0_i32_0 = arith.constant 0 : i32
    %c0_i32_1 = arith.constant 0 : i32
    return %c0_i32, %c0_i32_0 : i32, i32
  }
  func.func @transform_3(%arg0: i32) -> (i32, i32) {
    %c0_i32 = arith.constant 0 : i32
    %c0_i32_0 = arith.constant 0 : i32
    %c0_i32_1 = arith.constant 0 : i32
    return %c0_i32, %c0_i32_0 : i32, i32
  }
  func.func @transform_4(%arg0: i32) -> (i32, i32) {
    %c0_i32 = arith.constant 0 : i32
    %c0_i32_0 = arith.constant 0 : i32
    return %arg0, %c0_i32 : i32, i32
  }
  func.func @transform_5(%arg0: i32) -> (i32, i32) {
    %c0_i32 = arith.constant 0 : i32
    %c0_i32_0 = arith.constant 0 : i32
    return %arg0, %c0_i32 : i32, i32
  }
}

module attributes {stable_mosaic.version = 11 : i64} {
  func.func @_matmul_kernel(%arg0: i32, %arg1: i32, %arg2: i32, %arg3: memref<16x32xbf16, #tpu.memory_space<vmem>>, %arg4: memref<32x64xbf16, #tpu.memory_space<vmem>>, %arg5: memref<16x64xf32, #tpu.memory_space<vmem>>, %arg6: memref<16x64xf32, #tpu.memory_space<vmem>>) attributes {dimension_semantics = [#tpu.dimension_semantics<parallel>, #tpu.dimension_semantics<parallel>, #tpu.dimension_semantics<arbitrary>], iteration_bounds = array<i64: 1, 1, 1>, scalar_prefetch = 0 : i64, scratch_operands = 1 : i64, tpu.core_type = #tpu.core_type<tc>, window_params = [{transform_indices = @transform_0, window_bounds = array<i64: 16, 32>}, {transform_indices = @transform_1, window_bounds = array<i64: 32, 64>}, {transform_indices = @transform_2, window_bounds = array<i64: 16, 64>}]} {
    %c0_i32 = arith.constant 0 : i32
    %0 = arith.cmpi eq, %arg2, %c0_i32 : i32
    %1 = arith.extui %0 : i1 to i32
    %c0_i32_0 = arith.constant 0 : i32
    %2 = arith.cmpi ne, %1, %c0_i32_0 : i32
    scf.if %2 {
      %cst_10 = arith.constant 0.000000e+00 : f32
      %12 = vector.broadcast %cst_10 : f32 to vector<16x64xf32>
      %c0_11 = arith.constant 0 : index
      %c0_12 = arith.constant 0 : index
      %13 = vector.load %arg6[%c0_11, %c0_12] : memref<16x64xf32, #tpu.memory_space<vmem>>, vector<16x64xf32>
      tpu.vector_store %arg6[%c0_11, %c0_12], %12 {strides = array<i32>} : memref<16x64xf32, #tpu.memory_space<vmem>>, vector<16x64xf32>,
    } else {
    }
    %c0 = arith.constant 0 : index
    %c0_1 = arith.constant 0 : index
    %3 = vector.load %arg6[%c0, %c0_1] : memref<16x64xf32, #tpu.memory_space<vmem>>, vector<16x64xf32>
    %c0_2 = arith.constant 0 : index
    %c0_3 = arith.constant 0 : index
    %4 = vector.load %arg3[%c0_2, %c0_3] : memref<16x32xbf16, #tpu.memory_space<vmem>>, vector<16x32xbf16>
    %c0_4 = arith.constant 0 : index
    %c0_5 = arith.constant 0 : index
    %5 = vector.load %arg4[%c0_4, %c0_5] : memref<32x64xbf16, #tpu.memory_space<vmem>>, vector<32x64xbf16>
    %cst = arith.constant dense<0.000000e+00> : vector<16x64xf32>
    %6 = tpu.matmul %4, %5, %cst {dimension_numbers = #tpu.dot_dimension_numbers<[1], [0], [0], [1], [0, 0, 1, 1], [], []>} : vector<16x32xbf16>, vector<32x64xbf16>, vector<16x64xf32> -> vector<16x64xf32>
    %7 = arith.addf %3, %6 : vector<16x64xf32>
    %c0_6 = arith.constant 0 : index
    %c0_7 = arith.constant 0 : index
    %8 = vector.load %arg6[%c0_6, %c0_7] : memref<16x64xf32, #tpu.memory_space<vmem>>, vector<16x64xf32>
    tpu.vector_store %arg6[%c0_6, %c0_7], %7 {strides = array<i32>} : memref<16x64xf32, #tpu.memory_space<vmem>>, vector<16x64xf32>,
    %c0_i32_8 = arith.constant 0 : i32
    %9 = arith.cmpi eq, %arg2, %c0_i32_8 : i32
    %10 = arith.extui %9 : i1 to i32
    %c0_i32_9 = arith.constant 0 : i32
    %11 = arith.cmpi ne, %10, %c0_i32_9 : i32
    scf.if %11 {
      %c0_10 = arith.constant 0 : index
      %c0_11 = arith.constant 0 : index
      %12 = vector.load %arg6[%c0_10, %c0_11] : memref<16x64xf32, #tpu.memory_space<vmem>>, vector<16x64xf32>
      %c0_12 = arith.constant 0 : index
      %c0_13 = arith.constant 0 : index
      %13 = vector.load %arg5[%c0_12, %c0_13] : memref<16x64xf32, #tpu.memory_space<vmem>>, vector<16x64xf32>
      tpu.vector_store %arg5[%c0_12, %c0_13], %12 {strides = array<i32>} : memref<16x64xf32, #tpu.memory_space<vmem>>, vector<16x64xf32>,
    } else {
    }
    return
  }
  func.func @transform_0(%arg0: i32, %arg1: i32, %arg2: i32) -> (i32, i32) {
    %c0_i32 = arith.constant 0 : i32
    return %arg0, %arg2 : i32, i32
  }
  func.func @transform_1(%arg0: i32, %arg1: i32, %arg2: i32) -> (i32, i32) {
    %c0_i32 = arith.constant 0 : i32
    return %arg2, %arg1 : i32, i32
  }
  func.func @transform_2(%arg0: i32, %arg1: i32, %arg2: i32) -> (i32, i32) {
    %c0_i32 = arith.constant 0 : i32
    return %arg0, %arg1 : i32, i32
  }
}

</mosaic_0001>

<bundles_post_ra>
// kernel: _lambda_.29
= control target key start
LH: loop header
LB: loop body
LE: loop exit
PB: predicated region body
PF: predicated region fallthrough
CT: control target
= control target key end

     0   :  { %vm16_vm0 = vcmask 261120   ;;  %v125_v0 = vmov 0.0   ;;  %vm126_vm1 = vmmov 0   ;;  %vm36_vm2 = vcmask 130048   ;;  %s158_s1 = inlined_call_operand.vmem [shape: bf16[16,32], index: 1, kind: input, shape index: {}]   ;;  %s159_s0 = inlined_call_operand.vmem [shape: bf16[16,16], index: 0, kind: input, shape index: {}]   ;;  %s160_s2 = inlined_call_operand.vmem [shape: bf16[16,32], index: 2, kind: output, shape index: {}]  }
   0x1   :  { %17 = vst.msk [vmem:[#allocation2] sm:$0xff] %vm16_vm0, %v125_v0  ;;  %18 = vst.msk [vmem:[#allocation2 + $0x8] sm:$0xff] %vm16_vm0, %v125_v0  ;;  %115 = vmatprep.subr.bf16.mxu0 %v125_v0  ;;  %v123_v1 = vld [vmem:[%s158_s1] sm:$0xff]   ;;  %117 = vmatprep.mubr.msk.bf16.mxu0 %vm126_vm1, %v125_v0  ;;  %vm99_vm3 = vcmask 257024  }
   0x2   :  { %v124_v2 = vld [vmem:[%s159_s0] sm:$0xff]   ;;  %116 = vmatpush3.bf16.msra.mxu0 %v123_v1 }
   0x5   :  { %118 = vmatmul.mubr.msk.bf16.vlgmr.msra.gmra.mrb[0].mxu0 %vm36_vm2, %v124_v2 }
   0x8   :  { %v19_v3 = vld [vmem:[#allocation2] sm:$0xff]  ;;  %v20_v5 = vld [vmem:[#allocation2 + $0x8] sm:$0xff] }
  0xd8   :  { %v74_v4 = vpop.f32.mrb[0].mxu0 }
  0xd9   :  { %v81_v6 = vadd.f32 %v74_v4, %v19_v3  ;;  %v119_v7 = vpop.f32.mrb[1].mxu0 }
  0xda   :  { %v77_v8 = vpop.f32.mrb[2].mxu0 }
  0xdb   :  { %84 = vst.msk [vmem:[#allocation2] sm:$0xff] %vm16_vm0, %v81_v6  ;;  %v82_v9 = vadd.f32 %v77_v8, %v20_v5  ;;  %v120_v10 = vpop.f32.mrb[3].mxu0 }
  0xdd   :  { %85 = vst.msk [vmem:[#allocation2 + $0x8] sm:$0xff] %vm16_vm0, %v82_v9 }
  0xe2   :  { %v89_v11 = vld [vmem:[#allocation2] sm:$0xff] }
  0xe3   :  { %v111_v12 = vpack.c.bf16 %v89_v11, %v89_v11 }
  0xe4   :  { %v90_v13 = vld [vmem:[#allocation2 + $0x8] sm:$0xff] }
  0xe5   :  { %100 = vst.msk [vmem:[%s160_s2] sm:$0xf] %vm99_vm3, %v111_v12  ;;  %v112_v14 = vpack.c.bf16 %v90_v13, %v90_v13 }
  0xe7   :  { %101 = vst.msk [vmem:[%s160_s2 + $0x4] sm:$0xf] %vm99_vm3, %v112_v14 }

// kernel: _lambda_.27
= control target key start
LH: loop header
LB: loop body
LE: loop exit
PB: predicated region body
PF: predicated region fallthrough
CT: control target
= control target key end

     0   :  { %vm16_vm0 = vcmask 130048   ;;  %v138_v0 = vmov 0.0   ;;  %vm139_vm1 = vmmov 0   ;;  %vm44_vm2 = vcmask 261120   ;;  %s174_s1 = inlined_call_operand.vmem [shape: bf16[32,16], index: 1, kind: input, shape index: {}]   ;;  %s175_s0 = inlined_call_operand.vmem [shape: bf16[16,32], index: 0, kind: input, shape index: {}]   ;;  %s176_s2 = inlined_call_operand.vmem [shape: bf16[16,16], index: 2, kind: output, shape index: {}]  }
   0x1   :  { %125 = vmatprep.subr.bf16.mxu0 %v138_v0  ;;  %v135_v1 = vld [vmem:[%s174_s1] sm:$0xff]   ;;  %129 = vmatprep.mubr.msk.bf16.mxu0 %vm139_vm1, %v138_v0  ;;  %17 = vst.msk [vmem:[#allocation2] sm:$0xff] %vm16_vm0, %v138_v0  ;;  %18 = vst.msk [vmem:[#allocation2 + $0x8] sm:$0xff] %vm16_vm0, %v138_v0  ;;  %v136_v2 = vld [vmem:[%s174_s1 + $0x8] sm:$0xff]   ;;  %vm107_vm3 = vcmask 125952  }
   0x2   :  { %126 = vmatpush3.bf16.msra.mxu0 %v135_v1  ;;  %v137_v3 = vld [vmem:[%s175_s0] sm:$0xff]  }
   0x3   :  { %127 = vmatprep.subr.bf16.mxu0 %v138_v0 }
   0x6   :  { %128 = vmatpush3.bf16.msra.mxu0 %v136_v2 }
   0x8   :  { %v19_v4 = vld [vmem:[#allocation2] sm:$0xff]  ;;  %v20_v6 = vld [vmem:[#allocation2 + $0x8] sm:$0xff] }
   0x9   :  { %130 = vmatmul.mubr.msk.bf16.vlgmr.msra.gmra.mrb[0].mxu0 %vm44_vm2, %v137_v3 }
  0xdc   :  { %v82_v5 = vpop.f32.mrb[0].mxu0 }
  0xdd   :  { %v89_v7 = vadd.f32 %v82_v5, %v19_v4  ;;  %v131_v8 = vpop.f32.mrb[1].mxu0 }
  0xde   :  { %v85_v9 = vpop.f32.mrb[2].mxu0 }
  0xdf   :  { %92 = vst.msk [vmem:[#allocation2] sm:$0xff] %vm16_vm0, %v89_v7  ;;  %v90_v10 = vadd.f32 %v85_v9, %v20_v6  ;;  %v132_v11 = vpop.f32.mrb[3].mxu0 }
  0xe1   :  { %93 = vst.msk [vmem:[#allocation2 + $0x8] sm:$0xff] %vm16_vm0, %v90_v10 }
  0xe6   :  { %v97_v12 = vld [vmem:[#allocation2] sm:$0xff] }
  0xe7   :  { %v120_v13 = vpack.c.bf16 %v97_v12, %v97_v12 }
  0xe8   :  { %v98_v14 = vld [vmem:[#allocation2 + $0x8] sm:$0xff] }
  0xe9   :  { %108 = vst.msk [vmem:[%s176_s2] sm:$0xf] %vm107_vm3, %v120_v13  ;;  %v121_v15 = vpack.c.bf16 %v98_v14, %v98_v14 }
  0xeb   :  { %109 = vst.msk [vmem:[%s176_s2 + $0x4] sm:$0xf] %vm107_vm3, %v121_v15 }

// kernel: _lambda_.28
= control target key start
LH: loop header
LB: loop body
LE: loop exit
PB: predicated region body
PF: predicated region fallthrough
CT: control target
= control target key end

     0   :  { %vm18_vm0 = vcmask 130048   ;;  %vm72_vm1 = vcmask 125952   ;;  %s132_s0 = inlined_call_operand.vmem [shape: bf16[16,16], index: 0, kind: input, shape index: {}]   ;;  %s133_s1 = inlined_call_operand.vmem [shape: f32[1,16], index: 1, kind: input, shape index: {}]   ;;  %s134_s2 = inlined_call_operand.vmem [shape: f32[1,16], index: 2, kind: input, shape index: {}]   ;;  %s135_s3 = inlined_call_operand.vmem [shape: bf16[16,16], index: 3, kind: output, shape index: {}]  }
   0x1   :  { %v86_v0 = vld [vmem:[%s132_s0] sm:$0xff]  }
   0x2   :  { %v87_v1 = vunpack.c.l.bf16 %v86_v0  ;;  %v88_v2 = vunpack.c.h.bf16 %v86_v0  ;;  %v79_v22 = vld [vmem:[%s133_s1] ss:$0 sm:$0xff] }
   0x3   :  { %v80_v24 = vld [vmem:[%s134_s2] ss:$0 sm:$0xff] }
   0x4   :  { %v19_v3 = vsel %vm18_vm0, %v87_v1, 0.0  ;;  %v22_v4 = vsel %vm18_vm0, %v88_v2, 0.0 }
   0x5   :  { %20 = vadd.xlane.f32.xlu0 %v19_v3 }
   0x9   :  { %23 = vadd.xlane.f32.xlu0 %v22_v4 }
  0x92   :  { %v21_v5 = vpop.xlane.xlu0 %20 }
  0x93   :  { %v26_v6 = vmul.f32 0.0625, %v21_v5 }
  0x95   :  { %v28_v7 = vsub.f32 %v87_v1, %v26_v6 }
  0x96   :  { %v24_v8 = vpop.xlane.xlu0 %23 }
  0x97   :  { %v27_v9 = vmul.f32 0.0625, %v24_v8  ;;  %v30_v10 = vmul.f32 %v28_v7, %v28_v7 }
  0x99   :  { %v29_v11 = vsub.f32 %v88_v2, %v27_v9  ;;  %v32_v12 = vsel %vm18_vm0, %v30_v10, 0.0 }
  0x9a   :  { %33 = vadd.xlane.f32.xlu1 %v32_v12 }
  0x9b   :  { %v31_v13 = vmul.f32 %v29_v11, %v29_v11 }
  0x9d   :  { %v35_v14 = vsel %vm18_vm0, %v31_v13, 0.0 }
  0x9e   :  { %36 = vadd.xlane.f32.xlu1 %v35_v14 }
 0x127   :  { %v34_v15 = vpop.xlane.xlu1 %33 }
 0x128   :  { %v38_v16 = vmul.f32 0.0625, %v34_v15 }
 0x12a   :  { %v40_v17 = vadd.f32 1e-05, %v38_v16 }
 0x12b   :  { %v37_v18 = vpop.xlane.xlu1 %36 }
 0x12c   :  { %89 = vrsqrt.f32 %v40_v17  ;;  %v39_v19 = vmul.f32 0.0625, %v37_v18 }
 0x12e   :  { %v41_v20 = vadd.f32 1e-05, %v39_v19 }
 0x130   :  { %91 = vrsqrt.f32 %v41_v20 }
 0x136   :  { %v90_v21 = vpop.eup %89 }
 0x137   :  { %v44_v23 = vmul.f32 %v90_v21, %v28_v7 }
 0x139   :  { %v53_v25 = vmul.f32 %v79_v22, %v44_v23 }
 0x13a   :  { %v92_v26 = vpop.eup %91 }
 0x13b   :  { %v62_v27 = vadd.f32 %v80_v24, %v53_v25  ;;  %v45_v28 = vmul.f32 %v92_v26, %v29_v11 }
 0x13d   :  { %v83_v29 = vpack.c.bf16 %v62_v27, %v62_v27  ;;  %v54_v30 = vmul.f32 %v79_v22, %v45_v28 }
 0x13f   :  { %73 = vst.msk [vmem:[%s135_s3] sm:$0xf] %vm72_vm1, %v83_v29  ;;  %v63_v31 = vadd.f32 %v80_v24, %v54_v30 }
 0x141   :  { %v84_v32 = vpack.c.bf16 %v63_v31, %v63_v31 }
 0x143   :  { %74 = vst.msk [vmem:[%s135_s3 + $0x4] sm:$0xf] %vm72_vm1, %v84_v32 }

// kernel: _lambda_.26
= control target key start
LH: loop header
LB: loop body
LE: loop exit
PB: predicated region body
PF: predicated region fallthrough
CT: control target
= control target key end

     0   :  { %vm16_vm0 = vcmask 261120   ;;  %vm70_vm1 = vcmask 257024   ;;  %s129_s0 = inlined_call_operand.vmem [shape: f32[16,32], index: 0, kind: input, shape index: {}]   ;;  %s130_s1 = inlined_call_operand.vmem [shape: f32[1,32], index: 1, kind: input, shape index: {}]   ;;  %s131_s2 = inlined_call_operand.vmem [shape: f32[1,32], index: 2, kind: input, shape index: {}]   ;;  %s132_s3 = inlined_call_operand.vmem [shape: bf16[16,32], index: 3, kind: output, shape index: {}]  }
   0x1   :  { %v14_v0 = vld [vmem:[%s129_s0] sm:$0xff]  ;;  %v15_v1 = vld [vmem:[%s129_s0 + $0x8] sm:$0xff] }
   0x2   :  { %v17_v2 = vsel %vm16_vm0, %v14_v0, 0.0  ;;  %v20_v3 = vsel %vm16_vm0, %v15_v1, 0.0  ;;  %v77_v21 = vld [vmem:[%s130_s1] ss:$0 sm:$0xff] }
   0x3   :  { %18 = vadd.xlane.f32.xlu0 %v17_v2  ;;  %v78_v23 = vld [vmem:[%s131_s2] ss:$0 sm:$0xff] }
   0x7   :  { %21 = vadd.xlane.f32.xlu0 %v20_v3 }
  0x90   :  { %v19_v4 = vpop.xlane.xlu0 %18 }
  0x91   :  { %v24_v5 = vmul.f32 0.03125, %v19_v4 }
  0x93   :  { %v26_v6 = vsub.f32 %v14_v0, %v24_v5 }
  0x94   :  { %v22_v7 = vpop.xlane.xlu0 %21 }
  0x95   :  { %v25_v8 = vmul.f32 0.03125, %v22_v7  ;;  %v28_v9 = vmul.f32 %v26_v6, %v26_v6 }
  0x97   :  { %v27_v10 = vsub.f32 %v15_v1, %v25_v8  ;;  %v30_v11 = vsel %vm16_vm0, %v28_v9, 0.0 }
  0x98   :  { %31 = vadd.xlane.f32.xlu1 %v30_v11 }
  0x99   :  { %v29_v12 = vmul.f32 %v27_v10, %v27_v10 }
  0x9b   :  { %v33_v13 = vsel %vm16_vm0, %v29_v12, 0.0 }
  0x9c   :  { %34 = vadd.xlane.f32.xlu1 %v33_v13 }
 0x125   :  { %v32_v14 = vpop.xlane.xlu1 %31 }
 0x126   :  { %v36_v15 = vmul.f32 0.03125, %v32_v14 }
 0x128   :  { %v38_v16 = vadd.f32 1e-05, %v36_v15 }
 0x129   :  { %v35_v17 = vpop.xlane.xlu1 %34 }
 0x12a   :  { %83 = vrsqrt.f32 %v38_v16  ;;  %v37_v18 = vmul.f32 0.03125, %v35_v17 }
 0x12c   :  { %v39_v19 = vadd.f32 1e-05, %v37_v18 }
 0x12e   :  { %85 = vrsqrt.f32 %v39_v19 }
 0x134   :  { %v84_v20 = vpop.eup %83 }
 0x135   :  { %v42_v22 = vmul.f32 %v84_v20, %v26_v6 }
 0x137   :  { %v51_v24 = vmul.f32 %v77_v21, %v42_v22 }
 0x138   :  { %v86_v25 = vpop.eup %85 }
 0x139   :  { %v60_v26 = vadd.f32 %v78_v23, %v51_v24  ;;  %v43_v27 = vmul.f32 %v86_v25, %v27_v10 }
 0x13b   :  { %v81_v28 = vpack.c.bf16 %v60_v26, %v60_v26  ;;  %v52_v29 = vmul.f32 %v77_v21, %v43_v27 }
 0x13d   :  { %71 = vst.msk [vmem:[%s132_s3] sm:$0xf] %vm70_vm1, %v81_v28  ;;  %v61_v30 = vadd.f32 %v78_v23, %v52_v29 }
 0x13f   :  { %v82_v31 = vpack.c.bf16 %v61_v30, %v61_v30 }
 0x141   :  { %72 = vst.msk [vmem:[%s132_s3 + $0x4] sm:$0xf] %vm70_vm1, %v82_v31 }

// kernel: _lambda_.34
= control target key start
LH: loop header
LB: loop body
LE: loop exit
PB: predicated region body
PF: predicated region fallthrough
CT: control target
= control target key end

     0   :  { %vm16_vm0 = vcmask 261120   ;;  %v137_v0 = vmov 0.0   ;;  %vm138_vm1 = vmmov 0   ;;  %vm106_vm2 = vcmask 257024   ;;  %s174_s1 = inlined_call_operand.vmem [shape: bf16[32,32], index: 1, kind: input, shape index: {}]   ;;  %s175_s0 = inlined_call_operand.vmem [shape: bf16[16,32], index: 0, kind: input, shape index: {}]   ;;  %s176_s2 = inlined_call_operand.vmem [shape: bf16[16,32], index: 2, kind: output, shape index: {}]  }
   0x1   :  { %124 = vmatprep.subr.bf16.mxu0 %v137_v0  ;;  %v134_v1 = vld [vmem:[%s174_s1] sm:$0xff]   ;;  %128 = vmatprep.mubr.msk.bf16.mxu0 %vm138_vm1, %v137_v0  ;;  %17 = vst.msk [vmem:[#allocation2] sm:$0xff] %vm16_vm0, %v137_v0  ;;  %18 = vst.msk [vmem:[#allocation2 + $0x8] sm:$0xff] %vm16_vm0, %v137_v0  ;;  %v135_v2 = vld [vmem:[%s174_s1 + $0x8] sm:$0xff]  }
   0x2   :  { %125 = vmatpush3.bf16.msra.mxu0 %v134_v1  ;;  %v136_v3 = vld [vmem:[%s175_s0] sm:$0xff]  }
   0x3   :  { %126 = vmatprep.subr.bf16.mxu0 %v137_v0 }
   0x6   :  { %127 = vmatpush3.bf16.msra.mxu0 %v135_v2 }
   0x8   :  { %v19_v4 = vld [vmem:[#allocation2] sm:$0xff]  ;;  %v20_v6 = vld [vmem:[#allocation2 + $0x8] sm:$0xff] }
   0x9   :  { %129 = vmatmul.mubr.msk.bf16.vlgmr.msra.gmra.mrb[0].mxu0 %vm16_vm0, %v136_v3 }
  0xdc   :  { %v82_v5 = vpop.f32.mrb[0].mxu0 }
  0xdd   :  { %v89_v7 = vadd.f32 %v82_v5, %v19_v4  ;;  %v130_v8 = vpop.f32.mrb[1].mxu0 }
  0xde   :  { %v85_v9 = vpop.f32.mrb[2].mxu0 }
  0xdf   :  { %91 = vst.msk [vmem:[#allocation2] sm:$0xff] %vm16_vm0, %v89_v7  ;;  %v90_v10 = vadd.f32 %v85_v9, %v20_v6  ;;  %v131_v11 = vpop.f32.mrb[3].mxu0 }
  0xe1   :  { %92 = vst.msk [vmem:[#allocation2 + $0x8] sm:$0xff] %vm16_vm0, %v90_v10 }
  0xe6   :  { %v96_v12 = vld [vmem:[#allocation2] sm:$0xff] }
  0xe7   :  { %v119_v13 = vpack.c.bf16 %v96_v12, %v96_v12 }
  0xe8   :  { %v97_v14 = vld [vmem:[#allocation2 + $0x8] sm:$0xff] }
  0xe9   :  { %107 = vst.msk [vmem:[%s176_s2] sm:$0xf] %vm106_vm2, %v119_v13  ;;  %v120_v15 = vpack.c.bf16 %v97_v14, %v97_v14 }
  0xeb   :  { %108 = vst.msk [vmem:[%s176_s2 + $0x4] sm:$0xf] %vm106_vm2, %v120_v15 }

// kernel: _lambda_.32
= control target key start
LH: loop header
LB: loop body
LE: loop exit
PB: predicated region body
PF: predicated region fallthrough
CT: control target
= control target key end

     0   :  { %vm16_vm0 = vcmask 523264   ;;  %v125_v0 = vmov 0.0   ;;  %vm126_vm1 = vmmov 0   ;;  %vm36_vm2 = vcmask 130048   ;;  %s158_s1 = inlined_call_operand.vmem [shape: bf16[16,64], index: 1, kind: input, shape index: {}]   ;;  %s159_s0 = inlined_call_operand.vmem [shape: bf16[16,16], index: 0, kind: input, shape index: {}]   ;;  %s160_s2 = inlined_call_operand.vmem [shape: bf16[16,64], index: 2, kind: output, shape index: {}]  }
   0x1   :  { %17 = vst.msk [vmem:[#allocation2] sm:$0xff] %vm16_vm0, %v125_v0  ;;  %18 = vst.msk [vmem:[#allocation2 + $0x8] sm:$0xff] %vm16_vm0, %v125_v0  ;;  %115 = vmatprep.subr.bf16.mxu0 %v125_v0  ;;  %v123_v1 = vld [vmem:[%s158_s1] sm:$0xff]   ;;  %117 = vmatprep.mubr.msk.bf16.mxu0 %vm126_vm1, %v125_v0  ;;  %vm99_vm3 = vcmask 519168  }
   0x2   :  { %v124_v2 = vld [vmem:[%s159_s0] sm:$0xff]   ;;  %116 = vmatpush3.bf16.msra.mxu0 %v123_v1 }
   0x5   :  { %118 = vmatmul.mubr.msk.bf16.vlgmr.msra.gmra.mrb[0].mxu0 %vm36_vm2, %v124_v2 }
   0x8   :  { %v19_v3 = vld [vmem:[#allocation2] sm:$0xff]  ;;  %v20_v5 = vld [vmem:[#allocation2 + $0x8] sm:$0xff] }
  0xd8   :  { %v74_v4 = vpop.f32.mrb[0].mxu0 }
  0xd9   :  { %v81_v6 = vadd.f32 %v74_v4, %v19_v3  ;;  %v119_v7 = vpop.f32.mrb[1].mxu0 }
  0xda   :  { %v77_v8 = vpop.f32.mrb[2].mxu0 }
  0xdb   :  { %84 = vst.msk [vmem:[#allocation2] sm:$0xff] %vm16_vm0, %v81_v6  ;;  %v82_v9 = vadd.f32 %v77_v8, %v20_v5  ;;  %v120_v10 = vpop.f32.mrb[3].mxu0 }
  0xdd   :  { %85 = vst.msk [vmem:[#allocation2 + $0x8] sm:$0xff] %vm16_vm0, %v82_v9 }
  0xe2   :  { %v89_v11 = vld [vmem:[#allocation2] sm:$0xff] }
  0xe3   :  { %v111_v12 = vpack.c.bf16 %v89_v11, %v89_v11 }
  0xe4   :  { %v90_v13 = vld [vmem:[#allocation2 + $0x8] sm:$0xff] }
  0xe5   :  { %100 = vst.msk [vmem:[%s160_s2] sm:$0xf] %vm99_vm3, %v111_v12  ;;  %v112_v14 = vpack.c.bf16 %v90_v13, %v90_v13 }
  0xe7   :  { %101 = vst.msk [vmem:[%s160_s2 + $0x4] sm:$0xf] %vm99_vm3, %v112_v14 }

// kernel: _lambda_.35
= control target key start
LH: loop header
LB: loop body
LE: loop exit
PB: predicated region body
PF: predicated region fallthrough
CT: control target
= control target key end

     0   :  { %vm27_vm0 = vcmask 261120   ;;  %vm83_vm1 = vcmask 257024   ;;  %s171_s0 = inlined_call_operand.vmem [shape: f32[16,32], index: 0, kind: input, shape index: {}]   ;;  %s172_s1 = inlined_call_operand.vmem [shape: bf16[16,32], index: 1, kind: input, shape index: {}]   ;;  %s173_s4 = inlined_call_operand.vmem [shape: f32[16,32], index: 4, kind: output, shape index: {0}]   ;;  %s174_s2 = inlined_call_operand.vmem [shape: f32[1,32], index: 2, kind: input, shape index: {}]   ;;  %s175_s3 = inlined_call_operand.vmem [shape: f32[1,32], index: 3, kind: input, shape index: {}]   ;;  %s176_s5 = inlined_call_operand.vmem [shape: bf16[16,32], index: 5, kind: output, shape index: {1}]  }
   0x1   :  { %v19_v0 = vld [vmem:[%s171_s0] sm:$0xff]  ;;  %v20_v2 = vld [vmem:[%s171_s0 + $0x8] sm:$0xff] }
   0x2   :  { %v101_v1 = vld [vmem:[%s172_s1] sm:$0xff]  }
   0x3   :  { %v102_v3 = vunpack.c.l.bf16 %v101_v1  ;;  %v103_v4 = vunpack.c.h.bf16 %v101_v1  ;;  %v94_v26 = vld [vmem:[%s174_s2] ss:$0 sm:$0xff] }
   0x4   :  { %v95_v28 = vld [vmem:[%s175_s3] ss:$0 sm:$0xff] }
   0x5   :  { %v25_v5 = vadd.f32 %v102_v3, %v19_v0  ;;  %v26_v6 = vadd.f32 %v103_v4, %v20_v2 }
   0x7   :  { %v30_v7 = vsel %vm27_vm0, %v25_v5, 0.0  ;;  %28 = vst.msk [vmem:[%s173_s4] sm:$0xff] %vm27_vm0, %v25_v5  ;;  %29 = vst.msk [vmem:[%s173_s4 + $0x8] sm:$0xff] %vm27_vm0, %v26_v6  ;;  %v33_v8 = vsel %vm27_vm0, %v26_v6, 0.0 }
   0x8   :  { %31 = vadd.xlane.f32.xlu0 %v30_v7 }
   0xc   :  { %34 = vadd.xlane.f32.xlu0 %v33_v8 }
  0x95   :  { %v32_v9 = vpop.xlane.xlu0 %31 }
  0x96   :  { %v37_v10 = vmul.f32 0.03125, %v32_v9 }
  0x98   :  { %v39_v11 = vsub.f32 %v25_v5, %v37_v10 }
  0x99   :  { %v35_v12 = vpop.xlane.xlu0 %34 }
  0x9a   :  { %v38_v13 = vmul.f32 0.03125, %v35_v12  ;;  %v41_v14 = vmul.f32 %v39_v11, %v39_v11 }
  0x9c   :  { %v40_v15 = vsub.f32 %v26_v6, %v38_v13  ;;  %v43_v16 = vsel %vm27_vm0, %v41_v14, 0.0 }
  0x9d   :  { %44 = vadd.xlane.f32.xlu1 %v43_v16 }
  0x9e   :  { %v42_v17 = vmul.f32 %v40_v15, %v40_v15 }
  0xa0   :  { %v46_v18 = vsel %vm27_vm0, %v42_v17, 0.0 }
  0xa1   :  { %47 = vadd.xlane.f32.xlu1 %v46_v18 }
 0x12a   :  { %v45_v19 = vpop.xlane.xlu1 %44 }
 0x12b   :  { %v49_v20 = vmul.f32 0.03125, %v45_v19 }
 0x12d   :  { %v51_v21 = vadd.f32 1e-05, %v49_v20 }
 0x12e   :  { %v48_v22 = vpop.xlane.xlu1 %47 }
 0x12f   :  { %104 = vrsqrt.f32 %v51_v21  ;;  %v50_v23 = vmul.f32 0.03125, %v48_v22 }
 0x131   :  { %v52_v24 = vadd.f32 1e-05, %v50_v23 }
 0x133   :  { %106 = vrsqrt.f32 %v52_v24 }
 0x139   :  { %v105_v25 = vpop.eup %104 }
 0x13a   :  { %v55_v27 = vmul.f32 %v105_v25, %v39_v11 }
 0x13c   :  { %v64_v29 = vmul.f32 %v94_v26, %v55_v27 }
 0x13d   :  { %v107_v30 = vpop.eup %106 }
 0x13e   :  { %v73_v31 = vadd.f32 %v95_v28, %v64_v29  ;;  %v56_v32 = vmul.f32 %v107_v30, %v40_v15 }
 0x140   :  { %v98_v33 = vpack.c.bf16 %v73_v31, %v73_v31  ;;  %v65_v34 = vmul.f32 %v94_v26, %v56_v32 }
 0x142   :  { %84 = vst.msk [vmem:[%s176_s5] sm:$0xf] %vm83_vm1, %v98_v33  ;;  %v74_v35 = vadd.f32 %v95_v28, %v65_v34 }
 0x144   :  { %v99_v36 = vpack.c.bf16 %v74_v35, %v74_v35 }
 0x146   :  { %85 = vst.msk [vmem:[%s176_s5 + $0x4] sm:$0xf] %vm83_vm1, %v99_v36 }

// kernel: _lambda_.33
= control target key start
LH: loop header
LB: loop body
LE: loop exit
PB: predicated region body
PF: predicated region fallthrough
CT: control target
= control target key end

     0   :  { %s637_s12 = smov 0   ;;  %s639_s13 = smov 0   ;;  %s693_s0 = inlined_call_operand.vmem [shape: bf16[8,8,8], index: 0, kind: input, shape index: {}]   ;;  %s694_s1 = inlined_call_operand.vmem [shape: bf16[8,8,8], index: 1, kind: input, shape index: {}]   ;;  %s695_s2 = inlined_call_operand.vmem [shape: bf16[8,8,8], index: 2, kind: input, shape index: {}]   ;;  %s696_s3 = inlined_call_operand.vmem [shape: bf16[8,8,8], index: 3, kind: output, shape index: {}]  }
   0x1   :  { %s641_s14 = smov 0  }
   0x2 LB: > { %s32_s15 = sadd.s32 1, %s607_s13  ;;  %p528_p0 = scmp.ge.s32.totalorder %s611_s14, 1  ;;  %s611_s14 = sphi %s641_s14, %s13_s14   ;;  %s607_s13 = sphi %s639_s13, %s698_s13   ;;  %s603_s12 = sphi %s637_s12, %s697_s12  }
   0x3   : > { %p34_p1 = scmp.ge.s32.totalorder %s32_s15, 8  ;;  %p190_p2 = scmp.lt.s32.totalorder %s611_s14, 9 }
   0x5   : > { %s700_s15 = smov (%p34_p1, %s32_s15), 0  ;;  %p191_p3 = pnand %p528_p0, %p190_p2 }
   0x6   : > { %p232_p4 = scmp.lt.s32.totalorder (!%p191_p3), %s603_s12, 7  ;;  %vm268_vm0 = vcmask (!%p191_p3), 64512   ;;  %v613_v0 = vmov (!%p191_p3), 0.0   ;;  %vm614_vm1 = vmmov (!%p191_p3), 0   ;;  %vm265_vm2 = vcmask (!%p191_p3), 7168  }
   0x7   : > { %194 = sbr.rel (%p191_p3) target bundleno = 823 (0x337), region = 32  ;;  %541 = vmatprep.subr.bf16.mxu0 (!%p191_p3), %v613_v0  ;;  %269 = vst.msk [vmem:[#allocation4] sm:$0xff] (!%p191_p3), %vm268_vm0, %v613_v0  ;;  %543 = vmatprep.mubr.msk.bf16.mxu0 (!%p191_p3), %vm614_vm1, %v613_v0  ;;  %v615_v4 = vmov (!%p191_p3), -inf   ;;  %v616_v10 = vmov (!%p191_p3), 0   ;;  %vm355_vm3 = vcmask (!%p191_p3), 1043456   ;;  %vm415_vm4 = vcmask (!%p191_p3), 60416  }
   0x8   : > { %547 = vmatprep.subr.bf16.mxu1 (!%p191_p3), %v613_v0  ;;  %549 = vmatprep.mubr.msk.bf16.mxu1 (!%p191_p3), %vm614_vm1, %v613_v0  ;;  %266 = vst.msk [vmem:[#allocation2] sm:$0xff] (!%p191_p3), %vm265_vm2, %v615_v4  ;;  %267 = vst.msk [vmem:[#allocation3] sm:$0xff] (!%p191_p3), %vm265_vm2, %v613_v0 }
   0x9   : > { %581 = vset.pattern.permute.xlu0 (!%p191_p3), %v616_v10  ;;  %582 = vset.pattern.permute.xlu1 (!%p191_p3), %v616_v10 }
   0xe   : > { %s702_s12 = smov (!%p232_p4, %s603_s12), 7  ;;  %v344_v31 = vld [vmem:[#allocation4] sm:$0xff] }
   0xf   : > { %s656_s16 = sshll.u32 %s702_s12, 2  ;;  %v320_v11 = vld [vmem:[#allocation2] sm:$0xff]  ;;  %v336_v25 = vld [vmem:[#allocation3] sm:$0xff] }
  0x10   : > { %s245_s19 = scalar_lea.vmem %s694_s1, %s656_s16  ;;  %s238_s22 = scalar_lea.vmem %s693_s0, %s656_s16 }
  0x11   : > { %v271_v1 = vld [vmem:[%s245_s19] sm:$0xf]  ;;  %s252_s25 = scalar_lea.vmem %s695_s2, %s656_s16  ;;  %s259_s28 = scalar_lea.vmem %s696_s3, %s656_s16 }
  0x12   : > { %v278_v2 = vsel %vm268_vm0, %v271_v1, 0  ;;  %v270_v3 = vld [vmem:[%s238_s22] sm:$0xf] }
  0x13   : > { %542 = vmatpush3.bf16.xpose.msra.mxu0 %v278_v2  ;;  %v272_v15 = vld [vmem:[%s252_s25] sm:$0xf] }
  0x14   : > { %v357_v16 = vsel %vm355_vm3, %v272_v15, 0 }
  0x15   : > { %548 = vmatpush3.bf16.msra.mxu1 %v357_v16 }
  0x1a   : > { %544 = vmatmul.mubr.msk.bf16.vlgmr.msra.gmra.mrb[0].mxu0 %vm268_vm0, %v270_v3 }
  0xed   : > { %v314_v5 = vpop.f32.mrb[0].mxu0 }
  0xee   : > { %v545_v6 = vpop.f32.mrb[1].mxu0  ;;  %v321_v7 = vsel %vm268_vm0, %v314_v5, -inf }
  0xef   : > { %322 = vmax.xlane.f32.xlu0 %v321_v7  ;;  %v317_v8 = vpop.f32.mrb[2].mxu0 }
  0xf0   : > { %v546_v9 = vpop.f32.mrb[3].mxu0 }
 0x17c   : > { %v323_v12 = vpop.xlane.xlu0 %322 }
 0x17d   : > { %v324_v13 = vmax.f32 %v320_v11, %v323_v12 }
 0x17f   : > { %v325_v14 = vsub.f32 %v320_v11, %v324_v13  ;;  %401 = vst.msk [vmem:[#allocation2] sm:$0xff] %vm265_vm2, %v324_v13  ;;  %330 = vperm.xlu0 %581, %v324_v13  }
 0x181   : > { %v326_v23 = vmul.f32 1.442695, %v325_v14 }
 0x1fe   : > { %v331_v17 = vpop.permute.xlu0 %330 }
 0x1ff   : > { %v333_v18 = vsub.f32 %v314_v5, %v331_v17 }
 0x201   : > { %v334_v19 = vmul.f32 1.442695, %v333_v18 }
 0x203   : > { %583 = vpow2.f32 %v334_v19 }
 0x204   : > { %585 = vpow2.f32 %v326_v23 }
 0x20d   : > { %v584_v20 = vpop.eup %583 }
 0x20e   : > { %v338_v21 = vsel %vm268_vm0, %v584_v20, 0.0  ;;  %v351_v22 = vpack.c.bf16 %v584_v20, %v584_v20  ;;  %v586_v24 = vpop.eup %585 }
 0x20f   : > { %339 = vadd.xlane.f32.xlu1 %v338_v21  ;;  %v337_v26 = vmul.f32 %v586_v24, %v336_v25 }
 0x210   : > { %550 = vmatmul.mubr.msk.bf16.vlgmr.msra.gmra.mrb[0].mxu1 %vm268_vm0, %v351_v22 }
 0x220   : > { %347 = vperm.xlu1 %582, %v586_v24  }
 0x29c   : > { %v340_v27 = vpop.xlane.xlu1 %339 }
 0x29d   : > { %v341_v28 = vadd.f32 %v340_v27, %v337_v26 }
 0x29f   : > { %343 = vst.msk [vmem:[#allocation3] sm:$0xff] %vm265_vm2, %v341_v28 }
 0x2a0   : > { %v348_v32 = vpop.permute.xlu1 %347 }
 0x2a1   : > { %v350_v33 = vmul.f32 %v348_v32, %v344_v31 }
 0x2a6   : > { %v406_v29 = vld [vmem:[#allocation3] sm:$0xff] }
 0x2a7   : > { %587 = vrcp.f32 %v406_v29 }
 0x2b1   : > { %v588_v30 = vpop.eup %587 }
 0x2b2   : > { %410 = vperm.xlu1 %582, %v588_v30  }
 0x2e3   : > { %v393_v34 = vpop.f32.mrb[0].mxu1 }
 0x2e4   : > { %v399_v35 = vadd.f32 %v393_v34, %v350_v33  ;;  %v551_v36 = vpop.f32.mrb[1].mxu1 }
 0x2e5   : > { %v396_v37 = vpop.f32.mrb[2].mxu1 }
 0x2e6   : > { %400 = vst.msk [vmem:[#allocation4] sm:$0xff] %vm268_vm0, %v399_v35  ;;  %v552_v38 = vpop.f32.mrb[3].mxu1 }
 0x2ed   : > { %v405_v39 = vld [vmem:[#allocation4] sm:$0xff] }
 0x331   : > { %v411_v40 = vpop.permute.xlu1 %410 }
 0x332   : > { %v413_v41 = vmul.f32 %v411_v40, %v405_v39 }
 0x334   : > { %v414_v42 = vpack.c.bf16 %v413_v41, %v413_v41 }
 0x336   : > { %416 = vst.msk [vmem:[%s259_s28] sm:$0xf] %vm415_vm4, %v414_v42 }
 0x337 PF: > { %s13_s14 = sadd.s32 1, %s611_s14   ;;  %s697_s12 = smov %s607_s13 }
 0x338   : > { %p10_p5 = scmp.ge.s32.totalorder %s13_s14, 10   ;;  %s698_s13 = smov %s700_s15 }
 0x33a   :  { %12 = sbr.rel (!%p10_p5) target bundleno = 2 (0x2), region = 76 }

// kernel: _lambda_.36
= control target key start
LH: loop header
LB: loop body
LE: loop exit
PB: predicated region body
PF: predicated region fallthrough
CT: control target
= control target key end

     0   :  { %vm16_vm0 = vcmask 64512   ;;  %v125_v0 = vmov 0.0   ;;  %vm126_vm1 = vmmov 0   ;;  %vm44_vm2 = vcmask 261120   ;;  %s163_s1 = inlined_call_operand.vmem [shape: bf16[32,8], index: 1, kind: input, shape index: {}]   ;;  %s164_s0 = inlined_call_operand.vmem [shape: bf16[16,32], index: 0, kind: input, shape index: {}]   ;;  %s165_s2 = inlined_call_operand.vmem [shape: f32[16,8], index: 2, kind: output, shape index: {}]  }
   0x1   :  { %112 = vmatprep.subr.bf16.mxu0 %v125_v0  ;;  %v122_v1 = vld [vmem:[%s163_s1] sm:$0xff]   ;;  %116 = vmatprep.mubr.msk.bf16.mxu0 %vm126_vm1, %v125_v0  ;;  %17 = vst.msk [vmem:[#allocation2] sm:$0xff] %vm16_vm0, %v125_v0  ;;  %18 = vst.msk [vmem:[#allocation2 + $0x8] sm:$0xff] %vm16_vm0, %v125_v0  ;;  %v123_v2 = vld [vmem:[%s163_s1 + $0x8] sm:$0xff]  }
   0x2   :  { %113 = vmatpush3.bf16.msra.mxu0 %v122_v1  ;;  %v124_v3 = vld [vmem:[%s164_s0] sm:$0xff]  }
   0x3   :  { %114 = vmatprep.subr.bf16.mxu0 %v125_v0 }
   0x6   :  { %115 = vmatpush3.bf16.msra.mxu0 %v123_v2 }
   0x8   :  { %v19_v4 = vld [vmem:[#allocation2] sm:$0xff]  ;;  %v20_v6 = vld [vmem:[#allocation2 + $0x8] sm:$0xff] }
   0x9   :  { %117 = vmatmul.mubr.msk.bf16.vlgmr.msra.gmra.mrb[0].mxu0 %vm44_vm2, %v124_v3 }
  0xdc   :  { %v82_v5 = vpop.f32.mrb[0].mxu0 }
  0xdd   :  { %v89_v7 = vadd.f32 %v82_v5, %v19_v4  ;;  %v118_v8 = vpop.f32.mrb[1].mxu0 }
  0xde   :  { %v85_v9 = vpop.f32.mrb[2].mxu0 }
  0xdf   :  { %92 = vst.msk [vmem:[#allocation2] sm:$0xff] %vm16_vm0, %v89_v7  ;;  %v90_v10 = vadd.f32 %v85_v9, %v20_v6  ;;  %v119_v11 = vpop.f32.mrb[3].mxu0 }
  0xe1   :  { %93 = vst.msk [vmem:[#allocation2 + $0x8] sm:$0xff] %vm16_vm0, %v90_v10 }
  0xe6   :  { %v97_v12 = vld [vmem:[#allocation2] sm:$0xff] }
  0xe7   :  { %99 = vst.msk [vmem:[%s165_s2] sm:$0xff] %vm16_vm0, %v97_v12 }
  0xe8   :  { %v98_v13 = vld [vmem:[#allocation2 + $0x8] sm:$0xff] }
  0xe9   :  { %100 = vst.msk [vmem:[%s165_s2 + $0x8] sm:$0xff] %vm16_vm0, %v98_v13 }

// kernel: _lambda_.37
= control target key start
LH: loop header
LB: loop body
LE: loop exit
PB: predicated region body
PF: predicated region fallthrough
CT: control target
= control target key end

     0   :  { %s1088_s0 = inlined_call_operand.vmem [shape: s32[10], index: 0, kind: input, shape index: {}]   ;;  %s1089_s1 = inlined_call_operand.vmem [shape: bf16[16,32], index: 1, kind: input, shape index: {}]   ;;  %s1090_s2 = inlined_call_operand.vmem [shape: f32[10,16,1], index: 2, kind: input, shape index: {}]   ;;  %s1091_s3 = inlined_call_operand.vmem [shape: bf16[10,32,64], index: 3, kind: input, shape index: {}]   ;;  %s1092_s4 = inlined_call_operand.vmem [shape: bf16[10,32,64], index: 4, kind: input, shape index: {}]   ;;  %s1093_s5 = inlined_call_operand.vmem [shape: bf16[10,64,32], index: 5, kind: input, shape index: {}]   ;;  %s1094_s6 = inlined_call_operand.vmem [shape: bf16[16,32], index: 6, kind: output, shape index: {}]  }
   0x1   :  { %s11_s23 = sshll.u32 %s1088_s0, 4  ;;  %s12_s23 = int_to_ptr.vmem [resolvable:$true] %s11_s23 }
   0x2   :  { %s931_s24 = scalar_lea.vmem %s12_s23, 16  ;;  %p936_p1 = scmp.lt.s32.totalorder %s12_s23, %s12_s23 }
   0x3   :  { %p932_p0 = scmp.ne.s32.totalorder %s12_s23, %s931_s24  ;;  %p937_p2 = scmp.lt.s32.totalorder %s931_s24, %s931_s24 }
   0x5   :  { %p938_p3 = por %p937_p2, %p936_p1 }
   0x7   :  { %p939_p4 = pnand %p938_p3, %p932_p0 }
   0x9   :  { %942 = shalt.err (!%p939_p4)  }
   0xa   :  { %s969_s25 = smov [#allocation4]  }
   0xb   :  { %14 = dma.vmem_to_smem %s12_s23, 16, %s969_s25, [#allocation3] }
   0xc   :  { %955 = dma.done.wait [#allocation3], 16 }
   0xd   :  { %956 = vsyncadd [#allocation3], 4294967280 }
   0xe   :  { %16 = sfence }
   0xf   :  { %s1012_s26 = smov 0   ;;  %s1014_s27 = smov 0  }
  0x10   :  { %s1016_s28 = smov 0  }
  0x11 LB: > { %s37_s0 = sadd.s32 1, %s963_s27  ;;  %p805_p5 = scmp.ge.s32.totalorder %s967_s28, 1  ;;  %s967_s28 = sphi %s1016_s28, %s22_s28   ;;  %s963_s27 = sphi %s1014_s27, %s1096_s27   ;;  %s959_s26 = sphi %s1012_s26, %s1095_s26  }
  0x12   : > { %p39_p6 = scmp.ge.s32.totalorder %s37_s0, 10  ;;  %p278_p7 = scmp.lt.s32.totalorder %s967_s28, 11 }
  0x14   : > { %s1098_s0 = smov (%p39_p6, %s37_s0), 0  ;;  %p279_p8 = pnand %p805_p5, %p278_p7 }
  0x15   : > { %p347_p9 = scmp.lt.s32.totalorder (!%p279_p8), %s959_s26, 9  ;;  %p389_p10 = scmp.eq.s32.totalorder (!%p279_p8), %s959_s26, 0 }
  0x16   : > { %282 = sbr.rel (%p279_p8) target bundleno = 528 (0x210), region = 40 }
  0x1d   : > { %s348_s29 = scalar_select %p347_p9, %s959_s26, 9 }
  0x1e   : > { %394 = sbr.rel (!%p389_p10) target bundleno = 37 (0x25), region = 44  ;;  %vm395_vm0 = vcmask (%p389_p10), 261120   ;;  %v970_v0 = vmov (%p389_p10), 0.0  }
  0x1f   : > { %s837_s30 = sshll.u32 %s348_s29, 4  ;;  %s840_s7 = sshll.u32 %s348_s29, 5  ;;  %396 = vst.msk [vmem:[#allocation2] sm:$0xff] (%p389_p10), %vm395_vm0, %v970_v0  ;;  %397 = vst.msk [vmem:[#allocation2 + $0x8] sm:$0xff] (%p389_p10), %vm395_vm0, %v970_v0 }
  0x20   : > { %s1038_s10 = scalar_lea.vmem %s1090_s2, %s837_s30  ;;  %s363_s13 = scalar_lea.vmem %s1091_s3, %s837_s30 }
  0x21   : > { %s1046_s16 = scalar_lea.vmem %s1092_s4, %s837_s30  ;;  %s1051_s19 = scalar_lea.vmem %s1093_s5, %s840_s7 }
  0x25 PF: > { %s399_s20 = sld [smem:[#allocation4 + %s959_s26]] }
  0x2b   : > { %p815_p11 = scmp.eq.s32.totalorder %s399_s20, 0 }
  0x2c   : > { %v914_v1 = vld [vmem:[%s363_s13] sm:$0xff] (!%p815_p11)   ;;  %v971_v2 = vmov (!%p815_p11), 0.0   ;;  %v915_v3 = vld [vmem:[%s363_s13 + $0x8] sm:$0xff] (!%p815_p11)   ;;  %vm972_vm1 = vmmov (!%p815_p11), 0   ;;  %v973_v5 = vmov (!%p815_p11), 0   ;;  %vm427_vm2 = vcmask (!%p815_p11), 261120  }
  0x2d   : > { %403 = sbr.rel (%p815_p11) target bundleno = 518 (0x206), region = 48  ;;  %856 = vmatprep.subr.bf16.mxu1 (!%p815_p11), %v971_v2  ;;  %872 = vmatprep.subr.bf16.mxu0 (!%p815_p11), %v971_v2  ;;  %v916_v4 = vld [vmem:[%s1089_s1] sm:$0xff] (!%p815_p11)   ;;  %v546_v8 = vld [vmem:[%s1038_s10 + $0x8] sm:$0xff] (!%p815_p11)  ;;  %v921_v12 = vld [vmem:[%s1051_s19 + $0x10] sm:$0xff] (!%p815_p11)   ;;  %vm594_vm3 = vcmask (!%p815_p11), 523264  }
  0x2e   : > { %857 = vmatpush3.bf16.msra.mxu1 (!%p815_p11), %v914_v1  ;;  %860 = vmatprep.mubr.msk.bf16.mxu1 (!%p815_p11), %vm972_vm1, %v971_v2  ;;  %v917_v6 = vld [vmem:[%s1046_s16] sm:$0xff] (!%p815_p11)   ;;  %v918_v9 = vld [vmem:[%s1046_s16 + $0x8] sm:$0xff] (!%p815_p11)   ;;  %v922_v13 = vld [vmem:[%s1051_s19 + $0x18] sm:$0xff] (!%p815_p11)  }
  0x2f   : > { %858 = vmatprep.subr.bf16.mxu1 (!%p815_p11), %v971_v2  ;;  %880 = vmatprep.mubr.msk.bf16.mxu0 (!%p815_p11), %vm972_vm1, %v971_v2  ;;  %v545_v7 = vld [vmem:[%s1038_s10] sm:$0xff] (!%p815_p11)  ;;  %v920_v11 = vld [vmem:[%s1051_s19 + $0x8] sm:$0xff] (!%p815_p11)  }
  0x30   : > { %913 = vset.pattern.permute.xlu0 (!%p815_p11), %v973_v5  ;;  %v919_v10 = vld [vmem:[%s1051_s19] sm:$0xff] (!%p815_p11)   ;;  %v561_v41 = vld [vmem:[#allocation2 + $0x8] sm:$0xff] (!%p815_p11) }
  0x31   : > { %549 = vperm.xlu0 (!%p815_p11), %913, %v545_v7   ;;  %873 = vmatpush3.bf16.msra.mxu0 (!%p815_p11), %v919_v10  ;;  %v560_v39 = vld [vmem:[#allocation2] sm:$0xff] (!%p815_p11) }
  0x32   : > { %859 = vmatpush3.bf16.msra.mxu1 (!%p815_p11), %v915_v3  ;;  %874 = vmatprep.subr.bf16.mxu0 (!%p815_p11), %v971_v2 }
  0x33   : > { %864 = vmatprep.subr.bf16.mxu1 (!%p815_p11), %v971_v2 }
  0x35   : > { %861 = vmatmul.mubr.msk.bf16.vlgmr.msra.gmra.mrb[0].mxu1 %vm427_vm2, %v916_v4  ;;  %554 = vperm.xlu0 %913, %v546_v8  }
  0x36   : > { %865 = vmatpush3.bf16.msra.mxu1 %v917_v6  ;;  %868 = vmatprep.mubr.msk.bf16.mxu1 %vm972_vm1, %v971_v2 }
  0x37   : > { %866 = vmatprep.subr.bf16.mxu1 %v971_v2  ;;  %875 = vmatpush3.bf16.msra.mxu0 %v920_v11 }
  0x38   : > { %876 = vmatprep.subr.bf16.mxu0 %v971_v2 }
  0x3a   : > { %867 = vmatpush3.bf16.msra.mxu1 %v918_v9 }
  0x3b   : > { %877 = vmatpush3.bf16.msra.mxu0 %v921_v12 }
  0x3c   : > { %878 = vmatprep.subr.bf16.mxu0 %v971_v2 }
  0x3d   : > { %869 = vmatmul.mubr.msk.bf16.vlgmr.msra.gmra.mrb[4].mxu1 %vm427_vm2, %v916_v4 }
  0x3f   : > { %879 = vmatpush3.bf16.msra.mxu0 %v922_v13 }
  0xb0   : > { %v550_v29 = vpop.permute.xlu0 %549 }
  0xb4   : > { %v555_v35 = vpop.permute.xlu0 %554 }
 0x108   : > { %v465_v14 = vpop.f32.mrb[0].mxu1 }
 0x109   : > { %v823_v15 = vmul.f32 -1.442695, %v465_v14  ;;  %v862_v16 = vpop.f32.mrb[1].mxu1 }
 0x10a   : > { %v468_v17 = vpop.f32.mrb[2].mxu1 }
 0x10b   : > { %923 = vpow2.f32 %v823_v15  ;;  %v824_v18 = vmul.f32 -1.442695, %v468_v17  ;;  %v863_v19 = vpop.f32.mrb[3].mxu1 }
 0x10d   : > { %925 = vpow2.f32 %v824_v18 }
 0x110   : > { %v522_v20 = vpop.f32.mrb[4].mxu1 }
 0x111   : > { %v870_v21 = vpop.f32.mrb[5].mxu1 }
 0x112   : > { %v525_v22 = vpop.f32.mrb[6].mxu1 }
 0x113   : > { %v871_v23 = vpop.f32.mrb[7].mxu1 }
 0x115   : > { %v924_v24 = vpop.eup %923 }
 0x116   : > { %v535_v25 = vadd.f32 1.0, %v924_v24 }
 0x117   : > { %v926_v26 = vpop.eup %925 }
 0x118   : > { %927 = vrcp.f32 %v535_v25  ;;  %v536_v27 = vadd.f32 1.0, %v926_v26 }
 0x11a   : > { %929 = vrcp.f32 %v536_v27 }
 0x122   : > { %v928_v28 = vpop.eup %927 }
 0x123   : > { %v541_v30 = vmul.f32 %v928_v28, %v465_v14 }
 0x124   : > { %v930_v31 = vpop.eup %929 }
 0x125   : > { %v542_v32 = vmul.f32 %v930_v31, %v468_v17  ;;  %v543_v33 = vmul.f32 %v541_v30, %v522_v20 }
 0x127   : > { %v544_v34 = vmul.f32 %v542_v32, %v525_v22  ;;  %v557_v36 = vmul.f32 %v550_v29, %v543_v33 }
 0x129   : > { %v558_v37 = vmul.f32 %v555_v35, %v544_v34 }
 0x12b   : > { %v559_v38 = vpack.c.bf16 %v558_v37, %v557_v36 }
 0x12d   : > { %881 = vmatmul.mubr.msk.bf16.vlgmr.msra.gmra.mrb[0].mxu0 %vm594_vm3, %v559_v38 }
 0x200   : > { %v632_v40 = vpop.f32.mrb[0].mxu0 }
 0x201   : > { %v639_v42 = vadd.f32 %v632_v40, %v560_v39  ;;  %v882_v43 = vpop.f32.mrb[1].mxu0 }
 0x202   : > { %v635_v44 = vpop.f32.mrb[2].mxu0 }
 0x203   : > { %641 = vst.msk [vmem:[#allocation2] sm:$0xff] %vm427_vm2, %v639_v42  ;;  %v640_v45 = vadd.f32 %v635_v44, %v561_v41  ;;  %v883_v46 = vpop.f32.mrb[3].mxu0 }
 0x205   : > { %642 = vst.msk [vmem:[#allocation2 + $0x8] sm:$0xff] %vm427_vm2, %v640_v45 }
 0x206 PF: > { %p643_p12 = scmp.eq.s32.totalorder %s959_s26, 9 }
 0x207   : > { %vm658_vm4 = vcmask (%p643_p12), 257024  }
 0x208   : > { %647 = sbr.rel (!%p643_p12) target bundleno = 528 (0x210), region = 52 }
 0x20a   : > { %v648_v47 = vld [vmem:[#allocation2] sm:$0xff] (%p643_p12) }
 0x20b   : > { %v843_v49 = vpack.c.bf16 (%p643_p12), %v648_v47, %v648_v47 }
 0x20c   : > { %v649_v48 = vld [vmem:[#allocation2 + $0x8] sm:$0xff] (%p643_p12) }
 0x20d   : > { %v844_v50 = vpack.c.bf16 (%p643_p12), %v649_v48, %v649_v48  ;;  %659 = vst.msk [vmem:[%s1094_s6] sm:$0xf] (%p643_p12), %vm658_vm4, %v843_v49 }
 0x20f   : > { %660 = vst.msk [vmem:[%s1094_s6 + $0x4] sm:$0xf] %vm658_vm4, %v844_v50 }
 0x210 PF: > { %s22_s28 = sadd.s32 1, %s967_s28   ;;  %s1095_s26 = smov %s963_s27 }
 0x211   : > { %p19_p13 = scmp.ge.s32.totalorder %s22_s28, 12   ;;  %s1096_s27 = smov %s1098_s0 }
 0x213   :  { %21 = sbr.rel (!%p19_p13) target bundleno = 17 (0x11), region = 94 }

// kernel: _lambda_.50
= control target key start
LH: loop header
LB: loop body
LE: loop exit
PB: predicated region body
PF: predicated region fallthrough
CT: control target
= control target key end

     0   :  { %s220_s0 = inlined_call_operand.vmem [shape: f32[16,32], index: 0, kind: input, shape index: {}]   ;;  %s221_s1 = inlined_call_operand.vmem [shape: bf16[16,32], index: 1, kind: input, shape index: {}]   ;;  %s222_s2 = inlined_call_operand.vmem [shape: f32[1,32], index: 2, kind: input, shape index: {}]   ;;  %s223_s3 = inlined_call_operand.vmem [shape: f32[1,32], index: 3, kind: input, shape index: {}]   ;;  %s224_s4 = inlined_call_operand.hbm [shape: f32[16,32], index: 4, kind: output, shape index: {0}]   ;;  %s225_s5 = inlined_call_operand.vmem [shape: bf16[16,32], index: 5, kind: output, shape index: {1}]  }
   0x1   :  { %v20_v0 = vld [vmem:[%s220_s0] sm:$0xff]  ;;  %v21_v2 = vld [vmem:[%s220_s0 + $0x8] sm:$0xff] }
   0x2   :  { %v114_v1 = vld [vmem:[%s221_s1] sm:$0xff]  }
   0x3   :  { %v115_v3 = vunpack.c.l.bf16 %v114_v1  ;;  %v116_v4 = vunpack.c.h.bf16 %v114_v1 }
   0x4   :  { %11 = vsyncpa [#allocation3], 0  ;;  %vm28_vm0 = vcmask 261120   ;;  %s148_s0 = smov [#allocation2]  }
   0x5   :  { %v26_v5 = vadd.f32 %v115_v3, %v20_v0  ;;  %v27_v6 = vadd.f32 %v116_v4, %v21_v2  ;;  %s92_s1 = sshll.u32 %s148_s0, 4  ;;  %s93_s1 = int_to_ptr.vmem [resolvable:$true] %s92_s1 }
   0x6   :  { %s124_s24 = scalar_lea.vmem %s93_s1, 256  ;;  %p129_p1 = scmp.lt.s32.totalorder %s93_s1, %s93_s1 }
   0x7   :  { %v31_v7 = vsel %vm28_vm0, %v26_v5, 0.0  ;;  %29 = vst.msk [vmem:[#allocation2] sm:$0xff] %vm28_vm0, %v26_v5  ;;  %30 = vst.msk [vmem:[#allocation2 + $0x8] sm:$0xff] %vm28_vm0, %v27_v6  ;;  %v34_v8 = vsel %vm28_vm0, %v27_v6, 0.0  ;;  %p125_p0 = scmp.ne.s32.totalorder %s93_s1, %s124_s24  ;;  %p130_p2 = scmp.lt.s32.totalorder %s124_s24, %s124_s24 }
   0x8   :  { %32 = vadd.xlane.f32.xlu0 %v31_v7 }
   0x9   :  { %p131_p3 = por %p130_p2, %p129_p1 }
   0xb   :  { %p132_p4 = pnand %p131_p3, %p125_p0 }
   0xc   :  { %35 = vadd.xlane.f32.xlu0 %v34_v8 }
  0x95   :  { %v33_v9 = vpop.xlane.xlu0 %32 }
  0x96   :  { %v38_v10 = vmul.f32 0.03125, %v33_v9 }
  0x98   :  { %v40_v11 = vsub.f32 %v26_v5, %v38_v10 }
  0x99   :  { %v36_v12 = vpop.xlane.xlu0 %35 }
  0x9a   :  { %v39_v13 = vmul.f32 0.03125, %v36_v12  ;;  %v42_v14 = vmul.f32 %v40_v11, %v40_v11 }
  0x9c   :  { %v41_v15 = vsub.f32 %v27_v6, %v39_v13  ;;  %v44_v16 = vsel %vm28_vm0, %v42_v14, 0.0 }
  0x9d   :  { %45 = vadd.xlane.f32.xlu1 %v44_v16 }
  0x9e   :  { %v43_v17 = vmul.f32 %v41_v15, %v41_v15 }
  0xa0   :  { %v47_v18 = vsel %vm28_vm0, %v43_v17, 0.0 }
  0xa1   :  { %48 = vadd.xlane.f32.xlu1 %v47_v18 }
  0xa2   :  { %135 = shalt.err (!%p132_p4)
}
  0xa3   :  { %s136_s27 = scalar_lea.hbm %s224_s4, 256 }
  0xa4   :  { %p137_p5 = scmp.ne.s32.totalorder %s224_s4, %s136_s27  ;;  %p140_p6 = scmp.lt.u32.totalorder %s136_s27, %s224_s4 }
  0xa6   :  { %p142_p7 = pnand %p140_p6, %p137_p5 }
  0xa8   :  { %145 = shalt.err (!%p142_p7)
}
  0xa9   :  { %s149_s7 = smov 128   ;;  %s150_s8 = smov 8   ;;  %v107_v26 = vld [vmem:[%s222_s2] ss:$0 sm:$0xff]  ;;  %vm84_vm1 = vcmask 257024  }
  0xaa   :  { %98 = dma.vmem_to_hbm [thread:$0]  %s93_s1, 256, %s224_s4, [#allocation3], %s149_s7, %s149_s7, %s150_s8  }
  0xab   :  { %v108_v28 = vld [vmem:[%s223_s3] ss:$0 sm:$0xff] }
 0x12a   :  { %v46_v19 = vpop.xlane.xlu1 %45 }
 0x12b   :  { %v50_v20 = vmul.f32 0.03125, %v46_v19 }
 0x12d   :  { %v52_v21 = vadd.f32 1e-05, %v50_v20 }
 0x12e   :  { %v49_v22 = vpop.xlane.xlu1 %48 }
 0x12f   :  { %120 = vrsqrt.f32 %v52_v21  ;;  %v51_v23 = vmul.f32 0.03125, %v49_v22 }
 0x131   :  { %v53_v24 = vadd.f32 1e-05, %v51_v23 }
 0x133   :  { %122 = vrsqrt.f32 %v53_v24 }
 0x139   :  { %v121_v25 = vpop.eup %120 }
 0x13a   :  { %v56_v27 = vmul.f32 %v121_v25, %v40_v11 }
 0x13c   :  { %v65_v29 = vmul.f32 %v107_v26, %v56_v27 }
 0x13d   :  { %v123_v30 = vpop.eup %122 }
 0x13e   :  { %v74_v31 = vadd.f32 %v108_v28, %v65_v29  ;;  %v57_v32 = vmul.f32 %v123_v30, %v41_v15 }
 0x140   :  { %v111_v33 = vpack.c.bf16 %v74_v31, %v74_v31  ;;  %v66_v34 = vmul.f32 %v107_v26, %v57_v32 }
 0x142   :  { %85 = vst.msk [vmem:[%s225_s5] sm:$0xf] %vm84_vm1, %v111_v33  ;;  %v75_v35 = vadd.f32 %v108_v28, %v66_v34 }
 0x144   :  { %v112_v36 = vpack.c.bf16 %v75_v35, %v75_v35 }
 0x146   :  { %86 = vst.msk [vmem:[%s225_s5 + $0x4] sm:$0xf] %vm84_vm1, %v112_v36 }
 0x147   :  { %146 = dma.done.wait [#allocation3], 256  }
 0x148   :  { %147 = vsyncadd [#allocation3], 4294967040 }
 0x149   :  { %106 = vsyncpa [#allocation3], 1 }

// kernel: _lambda_.51
= control target key start
LH: loop header
LB: loop body
LE: loop exit
PB: predicated region body
PF: predicated region fallthrough
CT: control target
= control target key end

     0   :  { %v165_v1 = vmov 0.0   ;;  %vm166_vm0 = vmmov 0   ;;  %vm17_vm1 = vcmask 523264   ;;  %s212_s0 = inlined_call_operand.vmem [shape: bf16[16,32], index: 0, kind: input, shape index: {}]   ;;  %s213_s1 = inlined_call_operand.vmem [shape: bf16[32,64], index: 1, kind: input, shape index: {}]   ;;  %s214_s2 = inlined_call_operand.hbm [shape: f32[16,64], index: 2, kind: output, shape index: {}]  }
   0x1   :  { %v138_v0 = vld [vmem:[%s213_s1] sm:$0xff]   ;;  %125 = vmatprep.subr.bf16.mxu0 %v165_v1  ;;  %v139_v2 = vld [vmem:[%s213_s1 + $0x8] sm:$0xff]   ;;  %129 = vmatprep.mubr.msk.bf16.mxu0 %vm166_vm0, %v165_v1 }
   0x2   :  { %126 = vmatpush3.bf16.msra.mxu0 %v138_v0 }
   0x3   :  { %127 = vmatprep.subr.bf16.mxu0 %v165_v1 }
   0x4   :  { %7 = vsyncpa [#allocation4], 0  ;;  %18 = vst.msk [vmem:[#allocation2] sm:$0xff] %vm17_vm1, %v165_v1  ;;  %v140_v3 = vld [vmem:[%s212_s0] sm:$0xff]   ;;  %vm45_vm2 = vcmask 261120   ;;  %s167_s1 = smov [#allocation3]  }
   0x5   :  { %19 = vst.msk [vmem:[#allocation2 + $0x8] sm:$0xff] %vm17_vm1, %v165_v1  ;;  %s107_s15 = sshll.u32 %s167_s1, 4  ;;  %s108_s15 = int_to_ptr.vmem [resolvable:$true] %s107_s15 }
   0x6   :  { %128 = vmatpush3.bf16.msra.mxu0 %v139_v2  ;;  %s141_s0 = scalar_lea.vmem %s108_s15, 256  ;;  %p146_p1 = scmp.lt.s32.totalorder %s108_s15, %s108_s15 }
   0x7   :  { %p142_p0 = scmp.ne.s32.totalorder %s108_s15, %s141_s0  ;;  %p147_p2 = scmp.lt.s32.totalorder %s141_s0, %s141_s0 }
   0x9   :  { %130 = vmatmul.mubr.msk.bf16.vlgmr.msra.gmra.mrb[0].mxu0 %vm45_vm2, %v140_v3  ;;  %p148_p3 = por %p147_p2, %p146_p1 }
   0xb   :  { %v20_v4 = vld [vmem:[#allocation2] sm:$0xff]  ;;  %p149_p4 = pnand %p148_p3, %p142_p0 }
   0xc   :  { %v21_v6 = vld [vmem:[#allocation2 + $0x8] sm:$0xff] }
  0xdc   :  { %v83_v5 = vpop.f32.mrb[0].mxu0 }
  0xdd   :  { %v90_v7 = vadd.f32 %v83_v5, %v20_v4  ;;  %v131_v8 = vpop.f32.mrb[1].mxu0 }
  0xde   :  { %v86_v9 = vpop.f32.mrb[2].mxu0 }
  0xdf   :  { %93 = vst.msk [vmem:[#allocation2] sm:$0xff] %vm17_vm1, %v90_v7  ;;  %v91_v10 = vadd.f32 %v86_v9, %v21_v6  ;;  %v132_v11 = vpop.f32.mrb[3].mxu0 }
  0xe1   :  { %94 = vst.msk [vmem:[#allocation2 + $0x8] sm:$0xff] %vm17_vm1, %v91_v10 }
  0xe6   :  { %v98_v12 = vld [vmem:[#allocation2] sm:$0xff] }
  0xe7   :  { %100 = vst.msk [vmem:[#allocation3] sm:$0xff] %vm17_vm1, %v98_v12 }
  0xe8   :  { %v99_v13 = vld [vmem:[#allocation2 + $0x8] sm:$0xff] }
  0xe9   :  { %101 = vst.msk [vmem:[#allocation3 + $0x8] sm:$0xff] %vm17_vm1, %v99_v13 }
  0xea   :  { %152 = shalt.err (!%p149_p4)
}
  0xeb   :  { %s153_s18 = scalar_lea.hbm %s214_s2, 256 }
  0xec   :  { %p154_p5 = scmp.ne.s32.totalorder %s214_s2, %s153_s18  ;;  %p157_p6 = scmp.lt.u32.totalorder %s153_s18, %s214_s2 }
  0xee   :  { %p159_p7 = pnand %p157_p6, %p154_p5 }
  0xf0   :  { %162 = shalt.err (!%p159_p7)
}
  0xf1   :  { %s168_s23 = smov 128   ;;  %s169_s24 = smov 8  }
  0xf2   :  { %113 = dma.vmem_to_hbm [thread:$0]  %s108_s15, 256, %s214_s2, [#allocation4], %s168_s23, %s168_s23, %s169_s24  }
  0xf3   :  { %163 = dma.done.wait [#allocation4], 256  }
  0xf4   :  { %164 = vsyncadd [#allocation4], 4294967040 }
  0xf5   :  { %117 = vsyncpa [#allocation4], 1 }

</bundles_post_ra>
